<compile_context>
chip_gen: v7x
topology: tpu7x:2x2x1
jax: 0.10.0
libtpu: 0.0.40
codegen_flags: <defaults>
</compile_context>

<pallas_src>
import math
import functools

import jax
import jax.numpy as jnp
from jax import lax
from jax.experimental import pallas as pl
from jax.experimental.pallas import tpu as pltpu


def _sparsemax_rows(z, *, chunk=128):
    """Sparsemax along the last axis of a 2D (rows, nk) array, sort-free.

    Support test: j in support  iff  1 + k_j * z_j > sum_{z_i >= z_j} z_i
    with k_j = #{i : z_i >= z_j}.  The reduction over i is chunked so the
    largest temporary is (rows, nk, chunk) rather than (rows, nk, nk).
    """
    rows, nk = z.shape
    z = z - jnp.max(z, axis=-1, keepdims=True)            # translation invariant
    k_j = jnp.zeros_like(z)
    s_j = jnp.zeros_like(z)
    for c0 in range(0, nk, chunk):                        # static unroll
        zc = z[:, c0:c0 + chunk]                          # (rows, C)
        ge = (zc[:, None, :] >= z[:, :, None]).astype(jnp.float32)   # (rows, nk, C)
        k_j = k_j + jnp.sum(ge, axis=-1)
        s_j = s_j + jnp.sum(ge * zc[:, None, :], axis=-1)
    support = ((1.0 + k_j * z) > s_j).astype(jnp.float32)  # (rows, nk)
    K = jnp.sum(support, axis=-1, keepdims=True)
    S = jnp.sum(support * z, axis=-1, keepdims=True)
    tau = (S - 1.0) / K
    return jnp.maximum(z - tau, 0.0)


def _attn_kernel(q_ref, k_ref, v_ref, w_ref, b_ref, out_ref, att_ref,
                 *, h, d_k, d_v):
    q = q_ref[...]           # (tq, d_model)
    k = k_ref[...]           # (nk, d_model)
    v = v_ref[...]           # (nk, d_model)
    scale = 1.0 / math.sqrt(d_k)

    head_outs = []
    for hh in range(h):                                   # heads fused in one program
        qh = q[:, hh * d_k:(hh + 1) * d_k]                # (tq, d_k)
        kh = k[:, hh * d_k:(hh + 1) * d_k]                # (nk, d_k)
        vh = v[:, hh * d_v:(hh + 1) * d_v]                # (nk, d_v)

        # scores: Q @ K^T via transposed contraction (no kT materialization)
        s = lax.dot_general(qh, kh, (((1,), (1,)), ((), ())),
                            preferred_element_type=jnp.float32) * scale   # (tq, nk)

        p = _sparsemax_rows(s)                            # (tq, nk)
        att_ref[hh] = p.astype(att_ref.dtype)

        head_outs.append(jnp.dot(p, vh, preferred_element_type=jnp.float32))  # (tq, d_v)

    # one fc_o matmul with K = h*d_v = d_model (instead of h tiny K=d_v matmuls)
    slab = jnp.concatenate(head_outs, axis=-1)            # (tq, h*d_v)
    out = jnp.dot(slab, w_ref[...], preferred_element_type=jnp.float32) + b_ref[...]
    out_ref[...] = out.astype(out_ref.dtype)


def simplified_sdpa(queries, keys, values, fc_w, fc_b, *, h):
    """queries: (b_s, nq, d_model); keys/values: (b_s, nk, d_model).
    fc_w: (h*d_v, d_model) applied as x @ fc_w + fc_b (transposed Linear
    weight). Returns (out, att) matching the PyTorch module's forward."""
    b_s, nq, d_model = queries.shape
    nk = keys.shape[1]
    d_k = d_model // h
    d_v = d_model // h

    # query-row tiling: cap per-step VMEM (needed for v7x's 64 MiB VMEM at
    # realistic nq); at the toy nq=8 this is a single tile.
    tq = 256 if (nq % 256 == 0) else nq
    nq_tiles = nq // tq

    bias2d = fc_b.reshape(1, d_model)
    kernel = functools.partial(_attn_kernel, h=h, d_k=d_k, d_v=d_v)

    out, att = pl.pallas_call(
        kernel,
        out_shape=(
            jax.ShapeDtypeStruct((b_s, nq, d_model), jnp.float32),
            jax.ShapeDtypeStruct((b_s, h, nq, nk), jnp.float32),
        ),
        grid=(b_s, nq_tiles),
        in_specs=[
            pl.BlockSpec((None, tq, d_model), lambda b, qi: (b, qi, 0)),   # q tile
            pl.BlockSpec((None, nk, d_model), lambda b, qi: (b, 0, 0)),    # full K
            pl.BlockSpec((None, nk, d_model), lambda b, qi: (b, 0, 0)),    # full V
            pl.BlockSpec((h * d_v, d_model), lambda b, qi: (0, 0)),        # fc_w
            pl.BlockSpec((1, d_model), lambda b, qi: (0, 0)),              # fc_b
        ],
        out_specs=(
            pl.BlockSpec((None, tq, d_model), lambda b, qi: (b, qi, 0)),   # out
            pl.BlockSpec((None, h, tq, nk), lambda b, qi: (b, 0, qi, 0)),  # att
        ),
        compiler_params=pltpu.CompilerParams(
            dimension_semantics=("parallel", "parallel"),
        ),
    )(queries, keys, values, fc_w, bias2d)
    return out, att


def _reference(queries, keys, values, fc_w, fc_b, *, h):
    """Pure-JAX reference (sort-based sparsemax) for correctness checking."""
    b_s, nq, d_model = queries.shape
    nk = keys.shape[1]
    d_k = d_model // h
    q = queries.reshape(b_s, nq, h, d_k).transpose(0, 2, 1, 3)
    k = keys.reshape(b_s, nk, h, d_k).transpose(0, 2, 3, 1)
    v = values.reshape(b_s, nk, h, d_k).transpose(0, 2, 1, 3)
    s = jnp.einsum("bhqd,bhdk->bhqk", q, k) / math.sqrt(d_k)

    def spmax(z):
        zs = jnp.sort(z, axis=-1)[..., ::-1]
        rng = jnp.arange(1, z.shape[-1] + 1, dtype=z.dtype)
        cs = jnp.cumsum(zs, axis=-1)
        cond = 1.0 + rng * zs > cs
        K = jnp.sum(cond, axis=-1, keepdims=True).astype(z.dtype)
        S = jnp.take_along_axis(cs, jnp.sum(cond, axis=-1, keepdims=True) - 1, axis=-1)
        tau = (S - 1.0) / K
        return jnp.maximum(z - tau, 0.0)

    att = spmax(s)
    out = jnp.einsum("bhqk,bhkd->bhqd", att, v).transpose(0, 2, 1, 3).reshape(b_s, nq, h * d_k)
    out = out @ fc_w + fc_b
    return out, att


if __name__ == "__main__":
    d_model, h = 32, 4
    b_s, nq, nk = 2, 8, 8

    key = jax.random.PRNGKey(0)
    kq, kk, kv, kw = jax.random.split(key, 4)
    queries = jax.random.normal(kq, (b_s, nq, d_model), dtype=jnp.float32)
    keys = jax.random.normal(kk, (b_s, nk, d_model), dtype=jnp.float32)
    values = jax.random.normal(kv, (b_s, nk, d_model), dtype=jnp.float32)

    # deterministic init matching the module: Linear weight ~ N(0, 0.001), bias = 0
    fc_w = 0.001 * jax.random.normal(kw, (h * (d_model // h), d_model), dtype=jnp.float32)
    fc_b = jnp.zeros((d_model,), dtype=jnp.float32)

    out, att = simplified_sdpa(queries, keys, values, fc_w, fc_b, h=h)
    out = jax.block_until_ready(out)
    att = jax.block_until_ready(att)

    ref_out, ref_att = _reference(queries, keys, values, fc_w, fc_b, h=h)
    assert jnp.allclose(out, ref_out, atol=1e-5, rtol=1e-5)
    assert jnp.allclose(att, ref_att, atol=1e-5, rtol=1e-5)

    print("KERNEL_OK")
</pallas_src>

<mosaic_0001>
module attributes {stable_mosaic.version = 11 : i64} {
  func.func @_attn_kernel(%arg0: i32, %arg1: i32, %arg2: memref<1x8x32xf32, #tpu.memory_space<vmem>>, %arg3: memref<1x8x32xf32, #tpu.memory_space<vmem>>, %arg4: memref<1x8x32xf32, #tpu.memory_space<vmem>>, %arg5: memref<32x32xf32, #tpu.memory_space<vmem>>, %arg6: memref<1x32xf32, #tpu.memory_space<vmem>>, %arg7: memref<1x8x32xf32, #tpu.memory_space<vmem>>, %arg8: memref<1x4x8x8xf32, #tpu.memory_space<vmem>>) attributes {dimension_semantics = [#tpu.dimension_semantics<parallel>, #tpu.dimension_semantics<parallel>], iteration_bounds = array<i64: 2, 1>, scalar_prefetch = 0 : i64, scratch_operands = 0 : i64, tpu.core_type = #tpu.core_type<tc>, window_params = [{transform_indices = @transform_0, window_bounds = array<i64: 1, 8, 32>}, {transform_indices = @transform_1, window_bounds = array<i64: 1, 8, 32>}, {transform_indices = @transform_2, window_bounds = array<i64: 1, 8, 32>}, {pipeline_mode = #tpu.pipeline_mode<synchronous>, transform_indices = @transform_3, window_bounds = array<i64: 32, 32>}, {pipeline_mode = #tpu.pipeline_mode<synchronous>, transform_indices = @transform_4, window_bounds = array<i64: 1, 32>}, {transform_indices = @transform_5, window_bounds = array<i64: 1, 8, 32>}, {transform_indices = @transform_6, window_bounds = array<i64: 1, 4, 8, 8>}]} {
    %c0 = arith.constant 0 : index
    %c0_0 = arith.constant 0 : index
    %c0_1 = arith.constant 0 : index
    %0 = vector.load %arg2[%c0, %c0_0, %c0_1] : memref<1x8x32xf32, #tpu.memory_space<vmem>>, vector<1x8x32xf32>
    %1 = vector.shape_cast %0 : vector<1x8x32xf32> to vector<8x32xf32>
    %c0_2 = arith.constant 0 : index
    %c0_3 = arith.constant 0 : index
    %c0_4 = arith.constant 0 : index
    %2 = vector.load %arg3[%c0_2, %c0_3, %c0_4] : memref<1x8x32xf32, #tpu.memory_space<vmem>>, vector<1x8x32xf32>
    %3 = vector.shape_cast %2 : vector<1x8x32xf32> to vector<8x32xf32>
    %c0_5 = arith.constant 0 : index
    %c0_6 = arith.constant 0 : index
    %c0_7 = arith.constant 0 : index
    %4 = vector.load %arg4[%c0_5, %c0_6, %c0_7] : memref<1x8x32xf32, #tpu.memory_space<vmem>>, vector<1x8x32xf32>
    %5 = vector.shape_cast %4 : vector<1x8x32xf32> to vector<8x32xf32>
    %6 = vector.extract_strided_slice %1 {offsets = [0, 0], sizes = [8, 8], strides = [1, 1]} : vector<8x32xf32> to vector<8x8xf32>
    %7 = vector.extract_strided_slice %3 {offsets = [0, 0], sizes = [8, 8], strides = [1, 1]} : vector<8x32xf32> to vector<8x8xf32>
    %8 = vector.extract_strided_slice %5 {offsets = [0, 0], sizes = [8, 8], strides = [1, 1]} : vector<8x32xf32> to vector<8x8xf32>
    %cst = arith.constant dense<0.000000e+00> : vector<8x8xf32>
    %9 = tpu.matmul %6, %7, %cst {dimension_numbers = #tpu.dot_dimension_numbers<[1], [1], [0], [0], [0, 0, 1, 0], [], []>} : vector<8x8xf32>, vector<8x8xf32>, vector<8x8xf32> -> vector<8x8xf32>
    %cst_8 = arith.constant 0.353553385 : f32
    %10 = vector.broadcast %cst_8 : f32 to vector<8x8xf32>
    %11 = arith.mulf %9, %10 : vector<8x8xf32>
    %cst_9 = arith.constant dense<0xFF800000> : vector<8xf32>
    %12 = vector.multi_reduction <maximumf>, %11, %cst_9 [1] : vector<8x8xf32> to vector<8xf32>
    %13 = vector.shape_cast %12 : vector<8xf32> to vector<8x1xf32>
    %14 = vector.broadcast %13 : vector<8x1xf32> to vector<8x8xf32>
    %15 = arith.subf %11, %14 : vector<8x8xf32>
    %cst_10 = arith.constant 0.000000e+00 : f32
    %16 = vector.broadcast %cst_10 : f32 to vector<8x8xf32>
    %cst_11 = arith.constant 0.000000e+00 : f32
    %17 = vector.broadcast %cst_11 : f32 to vector<8x8xf32>
    %18 = vector.shape_cast %15 : vector<8x8xf32> to vector<8x1x8xf32>
    %19 = vector.shape_cast %15 : vector<8x8xf32> to vector<8x8x1xf32>
    %20 = vector.broadcast %18 : vector<8x1x8xf32> to vector<8x8x8xf32>
    %21 = vector.broadcast %19 : vector<8x8x1xf32> to vector<8x8x8xf32>
    %22 = arith.cmpf oge, %20, %21 : vector<8x8x8xf32>
    %23 = arith.extui %22 : vector<8x8x8xi1> to vector<8x8x8xi32>
    %24 = arith.sitofp %23 : vector<8x8x8xi32> to vector<8x8x8xf32>
    %cst_12 = arith.constant dense<0.000000e+00> : vector<8x8xf32>
    %25 = vector.multi_reduction <add>, %24, %cst_12 [2] : vector<8x8x8xf32> to vector<8x8xf32>
    %26 = arith.addf %16, %25 : vector<8x8xf32>
    %27 = vector.shape_cast %15 : vector<8x8xf32> to vector<8x1x8xf32>
    %28 = vector.broadcast %27 : vector<8x1x8xf32> to vector<8x8x8xf32>
    %29 = arith.mulf %24, %28 : vector<8x8x8xf32>
    %cst_13 = arith.constant dense<0.000000e+00> : vector<8x8xf32>
    %30 = vector.multi_reduction <add>, %29, %cst_13 [2] : vector<8x8x8xf32> to vector<8x8xf32>
    %31 = arith.addf %17, %30 : vector<8x8xf32>
    %32 = arith.mulf %26, %15 : vector<8x8xf32>
    %cst_14 = arith.constant 1.000000e+00 : f32
    %33 = vector.broadcast %cst_14 : f32 to vector<8x8xf32>
    %34 = arith.addf %33, %32 : vector<8x8xf32>
    %35 = arith.cmpf ogt, %34, %31 : vector<8x8xf32>
    %36 = arith.extui %35 : vector<8x8xi1> to vector<8x8xi32>
    %37 = arith.sitofp %36 : vector<8x8xi32> to vector<8x8xf32>
    %cst_15 = arith.constant dense<0.000000e+00> : vector<8xf32>
    %38 = vector.multi_reduction <add>, %37, %cst_15 [1] : vector<8x8xf32> to vector<8xf32>
    %39 = vector.shape_cast %38 : vector<8xf32> to vector<8x1xf32>
    %40 = arith.mulf %37, %15 : vector<8x8xf32>
    %cst_16 = arith.constant dense<0.000000e+00> : vector<8xf32>
    %41 = vector.multi_reduction <add>, %40, %cst_16 [1] : vector<8x8xf32> to vector<8xf32>
    %42 = vector.shape_cast %41 : vector<8xf32> to vector<8x1xf32>
    %cst_17 = arith.constant 1.000000e+00 : f32
    %43 = vector.broadcast %cst_17 : f32 to vector<8x1xf32>
    %44 = arith.subf %42, %43 : vector<8x1xf32>
    %45 = arith.divf %44, %39 : vector<8x1xf32>
    %46 = vector.broadcast %45 : vector<8x1xf32> to vector<8x8xf32>
    %47 = arith.subf %15, %46 : vector<8x8xf32>
    %cst_18 = arith.constant 0.000000e+00 : f32
    %48 = vector.broadcast %cst_18 : f32 to vector<8x8xf32>
    %49 = arith.maximumf %47, %48 : vector<8x8xf32>
    %c0_19 = arith.constant 0 : index
    %c0_20 = arith.constant 0 : index
    %c0_21 = arith.constant 0 : index
    %c0_22 = arith.constant 0 : index
    %50 = vector.load %arg8[%c0_19, %c0_20, %c0_21, %c0_22] : memref<1x4x8x8xf32, #tpu.memory_space<vmem>>, vector<1x1x8x8xf32>
    %51 = vector.shape_cast %50 : vector<1x1x8x8xf32> to vector<8x8xf32>
    %52 = vector.shape_cast %49 : vector<8x8xf32> to vector<1x1x8x8xf32>
    tpu.vector_store %arg8[%c0_19, %c0_20, %c0_21, %c0_22], %52 {strides = array<i32>} : memref<1x4x8x8xf32, #tpu.memory_space<vmem>>, vector<1x1x8x8xf32>,
    %cst_23 = arith.constant dense<0.000000e+00> : vector<8x8xf32>
    %53 = tpu.matmul %49, %8, %cst_23 {dimension_numbers = #tpu.dot_dimension_numbers<[1], [0], [0], [1], [0, 0, 1, 1], [], []>} : vector<8x8xf32>, vector<8x8xf32>, vector<8x8xf32> -> vector<8x8xf32>
    %54 = vector.extract_strided_slice %1 {offsets = [0, 8], sizes = [8, 8], strides = [1, 1]} : vector<8x32xf32> to vector<8x8xf32>
    %55 = vector.extract_strided_slice %3 {offsets = [0, 8], sizes = [8, 8], strides = [1, 1]} : vector<8x32xf32> to vector<8x8xf32>
    %56 = vector.extract_strided_slice %5 {offsets = [0, 8], sizes = [8, 8], strides = [1, 1]} : vector<8x32xf32> to vector<8x8xf32>
    %cst_24 = arith.constant dense<0.000000e+00> : vector<8x8xf32>
    %57 = tpu.matmul %54, %55, %cst_24 {dimension_numbers = #tpu.dot_dimension_numbers<[1], [1], [0], [0], [0, 0, 1, 0], [], []>} : vector<8x8xf32>, vector<8x8xf32>, vector<8x8xf32> -> vector<8x8xf32>
    %cst_25 = arith.constant 0.353553385 : f32
    %58 = vector.broadcast %cst_25 : f32 to vector<8x8xf32>
    %59 = arith.mulf %57, %58 : vector<8x8xf32>
    %cst_26 = arith.constant dense<0xFF800000> : vector<8xf32>
    %60 = vector.multi_reduction <maximumf>, %59, %cst_26 [1] : vector<8x8xf32> to vector<8xf32>
    %61 = vector.shape_cast %60 : vector<8xf32> to vector<8x1xf32>
    %62 = vector.broadcast %61 : vector<8x1xf32> to vector<8x8xf32>
    %63 = arith.subf %59, %62 : vector<8x8xf32>
    %cst_27 = arith.constant 0.000000e+00 : f32
    %64 = vector.broadcast %cst_27 : f32 to vector<8x8xf32>
    %cst_28 = arith.constant 0.000000e+00 : f32
    %65 = vector.broadcast %cst_28 : f32 to vector<8x8xf32>
    %66 = vector.shape_cast %63 : vector<8x8xf32> to vector<8x1x8xf32>
    %67 = vector.shape_cast %63 : vector<8x8xf32> to vector<8x8x1xf32>
    %68 = vector.broadcast %66 : vector<8x1x8xf32> to vector<8x8x8xf32>
    %69 = vector.broadcast %67 : vector<8x8x1xf32> to vector<8x8x8xf32>
    %70 = arith.cmpf oge, %68, %69 : vector<8x8x8xf32>
    %71 = arith.extui %70 : vector<8x8x8xi1> to vector<8x8x8xi32>
    %72 = arith.sitofp %71 : vector<8x8x8xi32> to vector<8x8x8xf32>
    %cst_29 = arith.constant dense<0.000000e+00> : vector<8x8xf32>
    %73 = vector.multi_reduction <add>, %72, %cst_29 [2] : vector<8x8x8xf32> to vector<8x8xf32>
    %74 = arith.addf %64, %73 : vector<8x8xf32>
    %75 = vector.shape_cast %63 : vector<8x8xf32> to vector<8x1x8xf32>
    %76 = vector.broadcast %75 : vector<8x1x8xf32> to vector<8x8x8xf32>
    %77 = arith.mulf %72, %76 : vector<8x8x8xf32>
    %cst_30 = arith.constant dense<0.000000e+00> : vector<8x8xf32>
    %78 = vector.multi_reduction <add>, %77, %cst_30 [2] : vector<8x8x8xf32> to vector<8x8xf32>
    %79 = arith.addf %65, %78 : vector<8x8xf32>
    %80 = arith.mulf %74, %63 : vector<8x8xf32>
    %cst_31 = arith.constant 1.000000e+00 : f32
    %81 = vector.broadcast %cst_31 : f32 to vector<8x8xf32>
    %82 = arith.addf %81, %80 : vector<8x8xf32>
    %83 = arith.cmpf ogt, %82, %79 : vector<8x8xf32>
    %84 = arith.extui %83 : vector<8x8xi1> to vector<8x8xi32>
    %85 = arith.sitofp %84 : vector<8x8xi32> to vector<8x8xf32>
    %cst_32 = arith.constant dense<0.000000e+00> : vector<8xf32>
    %86 = vector.multi_reduction <add>, %85, %cst_32 [1] : vector<8x8xf32> to vector<8xf32>
    %87 = vector.shape_cast %86 : vector<8xf32> to vector<8x1xf32>
    %88 = arith.mulf %85, %63 : vector<8x8xf32>
    %cst_33 = arith.constant dense<0.000000e+00> : vector<8xf32>
    %89 = vector.multi_reduction <add>, %88, %cst_33 [1] : vector<8x8xf32> to vector<8xf32>
    %90 = vector.shape_cast %89 : vector<8xf32> to vector<8x1xf32>
    %cst_34 = arith.constant 1.000000e+00 : f32
    %91 = vector.broadcast %cst_34 : f32 to vector<8x1xf32>
    %92 = arith.subf %90, %91 : vector<8x1xf32>
    %93 = arith.divf %92, %87 : vector<8x1xf32>
    %94 = vector.broadcast %93 : vector<8x1xf32> to vector<8x8xf32>
    %95 = arith.subf %63, %94 : vector<8x8xf32>
    %cst_35 = arith.constant 0.000000e+00 : f32
    %96 = vector.broadcast %cst_35 : f32 to vector<8x8xf32>
    %97 = arith.maximumf %95, %96 : vector<8x8xf32>
    %c0_36 = arith.constant 0 : index
    %c1 = arith.constant 1 : index
    %c0_37 = arith.constant 0 : index
    %c0_38 = arith.constant 0 : index
    %98 = vector.load %arg8[%c0_36, %c1, %c0_37, %c0_38] : memref<1x4x8x8xf32, #tpu.memory_space<vmem>>, vector<1x1x8x8xf32>
    %99 = vector.shape_cast %98 : vector<1x1x8x8xf32> to vector<8x8xf32>
    %100 = vector.shape_cast %97 : vector<8x8xf32> to vector<1x1x8x8xf32>
    tpu.vector_store %arg8[%c0_36, %c1, %c0_37, %c0_38], %100 {strides = array<i32>} : memref<1x4x8x8xf32, #tpu.memory_space<vmem>>, vector<1x1x8x8xf32>,
    %cst_39 = arith.constant dense<0.000000e+00> : vector<8x8xf32>
    %101 = tpu.matmul %97, %56, %cst_39 {dimension_numbers = #tpu.dot_dimension_numbers<[1], [0], [0], [1], [0, 0, 1, 1], [], []>} : vector<8x8xf32>, vector<8x8xf32>, vector<8x8xf32> -> vector<8x8xf32>
    %102 = vector.extract_strided_slice %1 {offsets = [0, 16], sizes = [8, 8], strides = [1, 1]} : vector<8x32xf32> to vector<8x8xf32>
    %103 = vector.extract_strided_slice %3 {offsets = [0, 16], sizes = [8, 8], strides = [1, 1]} : vector<8x32xf32> to vector<8x8xf32>
    %104 = vector.extract_strided_slice %5 {offsets = [0, 16], sizes = [8, 8], strides = [1, 1]} : vector<8x32xf32> to vector<8x8xf32>
    %cst_40 = arith.constant dense<0.000000e+00> : vector<8x8xf32>
    %105 = tpu.matmul %102, %103, %cst_40 {dimension_numbers = #tpu.dot_dimension_numbers<[1], [1], [0], [0], [0, 0, 1, 0], [], []>} : vector<8x8xf32>, vector<8x8xf32>, vector<8x8xf32> -> vector<8x8xf32>
    %cst_41 = arith.constant 0.353553385 : f32
    %106 = vector.broadcast %cst_41 : f32 to vector<8x8xf32>
    %107 = arith.mulf %105, %106 : vector<8x8xf32>
    %cst_42 = arith.constant dense<0xFF800000> : vector<8xf32>
    %108 = vector.multi_reduction <maximumf>, %107, %cst_42 [1] : vector<8x8xf32> to vector<8xf32>
    %109 = vector.shape_cast %108 : vector<8xf32> to vector<8x1xf32>
    %110 = vector.broadcast %109 : vector<8x1xf32> to vector<8x8xf32>
    %111 = arith.subf %107, %110 : vector<8x8xf32>
    %cst_43 = arith.constant 0.000000e+00 : f32
    %112 = vector.broadcast %cst_43 : f32 to vector<8x8xf32>
    %cst_44 = arith.constant 0.000000e+00 : f32
    %113 = vector.broadcast %cst_44 : f32 to vector<8x8xf32>
    %114 = vector.shape_cast %111 : vector<8x8xf32> to vector<8x1x8xf32>
    %115 = vector.shape_cast %111 : vector<8x8xf32> to vector<8x8x1xf32>
    %116 = vector.broadcast %114 : vector<8x1x8xf32> to vector<8x8x8xf32>
    %117 = vector.broadcast %115 : vector<8x8x1xf32> to vector<8x8x8xf32>
    %118 = arith.cmpf oge, %116, %117 : vector<8x8x8xf32>
    %119 = arith.extui %118 : vector<8x8x8xi1> to vector<8x8x8xi32>
    %120 = arith.sitofp %119 : vector<8x8x8xi32> to vector<8x8x8xf32>
    %cst_45 = arith.constant dense<0.000000e+00> : vector<8x8xf32>
    %121 = vector.multi_reduction <add>, %120, %cst_45 [2] : vector<8x8x8xf32> to vector<8x8xf32>
    %122 = arith.addf %112, %121 : vector<8x8xf32>
    %123 = vector.shape_cast %111 : vector<8x8xf32> to vector<8x1x8xf32>
    %124 = vector.broadcast %123 : vector<8x1x8xf32> to vector<8x8x8xf32>
    %125 = arith.mulf %120, %124 : vector<8x8x8xf32>
    %cst_46 = arith.constant dense<0.000000e+00> : vector<8x8xf32>
    %126 = vector.multi_reduction <add>, %125, %cst_46 [2] : vector<8x8x8xf32> to vector<8x8xf32>
    %127 = arith.addf %113, %126 : vector<8x8xf32>
    %128 = arith.mulf %122, %111 : vector<8x8xf32>
    %cst_47 = arith.constant 1.000000e+00 : f32
    %129 = vector.broadcast %cst_47 : f32 to vector<8x8xf32>
    %130 = arith.addf %129, %128 : vector<8x8xf32>
    %131 = arith.cmpf ogt, %130, %127 : vector<8x8xf32>
    %132 = arith.extui %131 : vector<8x8xi1> to vector<8x8xi32>
    %133 = arith.sitofp %132 : vector<8x8xi32> to vector<8x8xf32>
    %cst_48 = arith.constant dense<0.000000e+00> : vector<8xf32>
    %134 = vector.multi_reduction <add>, %133, %cst_48 [1] : vector<8x8xf32> to vector<8xf32>
    %135 = vector.shape_cast %134 : vector<8xf32> to vector<8x1xf32>
    %136 = arith.mulf %133, %111 : vector<8x8xf32>
    %cst_49 = arith.constant dense<0.000000e+00> : vector<8xf32>
    %137 = vector.multi_reduction <add>, %136, %cst_49 [1] : vector<8x8xf32> to vector<8xf32>
    %138 = vector.shape_cast %137 : vector<8xf32> to vector<8x1xf32>
    %cst_50 = arith.constant 1.000000e+00 : f32
    %139 = vector.broadcast %cst_50 : f32 to vector<8x1xf32>
    %140 = arith.subf %138, %139 : vector<8x1xf32>
    %141 = arith.divf %140, %135 : vector<8x1xf32>
    %142 = vector.broadcast %141 : vector<8x1xf32> to vector<8x8xf32>
    %143 = arith.subf %111, %142 : vector<8x8xf32>
    %cst_51 = arith.constant 0.000000e+00 : f32
    %144 = vector.broadcast %cst_51 : f32 to vector<8x8xf32>
    %145 = arith.maximumf %143, %144 : vector<8x8xf32>
    %c0_52 = arith.constant 0 : index
    %c2 = arith.constant 2 : index
    %c0_53 = arith.constant 0 : index
    %c0_54 = arith.constant 0 : index
    %146 = vector.load %arg8[%c0_52, %c2, %c0_53, %c0_54] : memref<1x4x8x8xf32, #tpu.memory_space<vmem>>, vector<1x1x8x8xf32>
    %147 = vector.shape_cast %146 : vector<1x1x8x8xf32> to vector<8x8xf32>
    %148 = vector.shape_cast %145 : vector<8x8xf32> to vector<1x1x8x8xf32>
    tpu.vector_store %arg8[%c0_52, %c2, %c0_53, %c0_54], %148 {strides = array<i32>} : memref<1x4x8x8xf32, #tpu.memory_space<vmem>>, vector<1x1x8x8xf32>,
    %cst_55 = arith.constant dense<0.000000e+00> : vector<8x8xf32>
    %149 = tpu.matmul %145, %104, %cst_55 {dimension_numbers = #tpu.dot_dimension_numbers<[1], [0], [0], [1], [0, 0, 1, 1], [], []>} : vector<8x8xf32>, vector<8x8xf32>, vector<8x8xf32> -> vector<8x8xf32>
    %150 = vector.extract_strided_slice %1 {offsets = [0, 24], sizes = [8, 8], strides = [1, 1]} : vector<8x32xf32> to vector<8x8xf32>
    %151 = vector.extract_strided_slice %3 {offsets = [0, 24], sizes = [8, 8], strides = [1, 1]} : vector<8x32xf32> to vector<8x8xf32>
    %152 = vector.extract_strided_slice %5 {offsets = [0, 24], sizes = [8, 8], strides = [1, 1]} : vector<8x32xf32> to vector<8x8xf32>
    %cst_56 = arith.constant dense<0.000000e+00> : vector<8x8xf32>
    %153 = tpu.matmul %150, %151, %cst_56 {dimension_numbers = #tpu.dot_dimension_numbers<[1], [1], [0], [0], [0, 0, 1, 0], [], []>} : vector<8x8xf32>, vector<8x8xf32>, vector<8x8xf32> -> vector<8x8xf32>
    %cst_57 = arith.constant 0.353553385 : f32
    %154 = vector.broadcast %cst_57 : f32 to vector<8x8xf32>
    %155 = arith.mulf %153, %154 : vector<8x8xf32>
    %cst_58 = arith.constant dense<0xFF800000> : vector<8xf32>
    %156 = vector.multi_reduction <maximumf>, %155, %cst_58 [1] : vector<8x8xf32> to vector<8xf32>
    %157 = vector.shape_cast %156 : vector<8xf32> to vector<8x1xf32>
    %158 = vector.broadcast %157 : vector<8x1xf32> to vector<8x8xf32>
    %159 = arith.subf %155, %158 : vector<8x8xf32>
    %cst_59 = arith.constant 0.000000e+00 : f32
    %160 = vector.broadcast %cst_59 : f32 to vector<8x8xf32>
    %cst_60 = arith.constant 0.000000e+00 : f32
    %161 = vector.broadcast %cst_60 : f32 to vector<8x8xf32>
    %162 = vector.shape_cast %159 : vector<8x8xf32> to vector<8x1x8xf32>
    %163 = vector.shape_cast %159 : vector<8x8xf32> to vector<8x8x1xf32>
    %164 = vector.broadcast %162 : vector<8x1x8xf32> to vector<8x8x8xf32>
    %165 = vector.broadcast %163 : vector<8x8x1xf32> to vector<8x8x8xf32>
    %166 = arith.cmpf oge, %164, %165 : vector<8x8x8xf32>
    %167 = arith.extui %166 : vector<8x8x8xi1> to vector<8x8x8xi32>
    %168 = arith.sitofp %167 : vector<8x8x8xi32> to vector<8x8x8xf32>
    %cst_61 = arith.constant dense<0.000000e+00> : vector<8x8xf32>
    %169 = vector.multi_reduction <add>, %168, %cst_61 [2] : vector<8x8x8xf32> to vector<8x8xf32>
    %170 = arith.addf %160, %169 : vector<8x8xf32>
    %171 = vector.shape_cast %159 : vector<8x8xf32> to vector<8x1x8xf32>
    %172 = vector.broadcast %171 : vector<8x1x8xf32> to vector<8x8x8xf32>
    %173 = arith.mulf %168, %172 : vector<8x8x8xf32>
    %cst_62 = arith.constant dense<0.000000e+00> : vector<8x8xf32>
    %174 = vector.multi_reduction <add>, %173, %cst_62 [2] : vector<8x8x8xf32> to vector<8x8xf32>
    %175 = arith.addf %161, %174 : vector<8x8xf32>
    %176 = arith.mulf %170, %159 : vector<8x8xf32>
    %cst_63 = arith.constant 1.000000e+00 : f32
    %177 = vector.broadcast %cst_63 : f32 to vector<8x8xf32>
    %178 = arith.addf %177, %176 : vector<8x8xf32>
    %179 = arith.cmpf ogt, %178, %175 : vector<8x8xf32>
    %180 = arith.extui %179 : vector<8x8xi1> to vector<8x8xi32>
    %181 = arith.sitofp %180 : vector<8x8xi32> to vector<8x8xf32>
    %cst_64 = arith.constant dense<0.000000e+00> : vector<8xf32>
    %182 = vector.multi_reduction <add>, %181, %cst_64 [1] : vector<8x8xf32> to vector<8xf32>
    %183 = vector.shape_cast %182 : vector<8xf32> to vector<8x1xf32>
    %184 = arith.mulf %181, %159 : vector<8x8xf32>
    %cst_65 = arith.constant dense<0.000000e+00> : vector<8xf32>
    %185 = vector.multi_reduction <add>, %184, %cst_65 [1] : vector<8x8xf32> to vector<8xf32>
    %186 = vector.shape_cast %185 : vector<8xf32> to vector<8x1xf32>
    %cst_66 = arith.constant 1.000000e+00 : f32
    %187 = vector.broadcast %cst_66 : f32 to vector<8x1xf32>
    %188 = arith.subf %186, %187 : vector<8x1xf32>
    %189 = arith.divf %188, %183 : vector<8x1xf32>
    %190 = vector.broadcast %189 : vector<8x1xf32> to vector<8x8xf32>
    %191 = arith.subf %159, %190 : vector<8x8xf32>
    %cst_67 = arith.constant 0.000000e+00 : f32
    %192 = vector.broadcast %cst_67 : f32 to vector<8x8xf32>
    %193 = arith.maximumf %191, %192 : vector<8x8xf32>
    %c0_68 = arith.constant 0 : index
    %c3 = arith.constant 3 : index
    %c0_69 = arith.constant 0 : index
    %c0_70 = arith.constant 0 : index
    %194 = vector.load %arg8[%c0_68, %c3, %c0_69, %c0_70] : memref<1x4x8x8xf32, #tpu.memory_space<vmem>>, vector<1x1x8x8xf32>
    %195 = vector.shape_cast %194 : vector<1x1x8x8xf32> to vector<8x8xf32>
    %196 = vector.shape_cast %193 : vector<8x8xf32> to vector<1x1x8x8xf32>
    tpu.vector_store %arg8[%c0_68, %c3, %c0_69, %c0_70], %196 {strides = array<i32>} : memref<1x4x8x8xf32, #tpu.memory_space<vmem>>, vector<1x1x8x8xf32>,
    %cst_71 = arith.constant dense<0.000000e+00> : vector<8x8xf32>
    %197 = tpu.matmul %193, %152, %cst_71 {dimension_numbers = #tpu.dot_dimension_numbers<[1], [0], [0], [1], [0, 0, 1, 1], [], []>} : vector<8x8xf32>, vector<8x8xf32>, vector<8x8xf32> -> vector<8x8xf32>
    %198 = tpu.concatenate %53, %101, %149, %197 in 1 : vector<8x8xf32>, vector<8x8xf32>, vector<8x8xf32>, vector<8x8xf32> -> vector<8x32xf32>
    %c0_72 = arith.constant 0 : index
    %c0_73 = arith.constant 0 : index
    %199 = vector.load %arg5[%c0_72, %c0_73] : memref<32x32xf32, #tpu.memory_space<vmem>>, vector<32x32xf32>
    %cst_74 = arith.constant dense<0.000000e+00> : vector<8x32xf32>
    %200 = tpu.matmul %198, %199, %cst_74 {dimension_numbers = #tpu.dot_dimension_numbers<[1], [0], [0], [1], [0, 0, 1, 1], [], []>} : vector<8x32xf32>, vector<32x32xf32>, vector<8x32xf32> -> vector<8x32xf32>
    %c0_75 = arith.constant 0 : index
    %c0_76 = arith.constant 0 : index
    %201 = vector.load %arg6[%c0_75, %c0_76] : memref<1x32xf32, #tpu.memory_space<vmem>>, vector<1x32xf32>
    %202 = vector.broadcast %201 : vector<1x32xf32> to vector<8x32xf32>
    %203 = arith.addf %200, %202 : vector<8x32xf32>
    %c0_77 = arith.constant 0 : index
    %c0_78 = arith.constant 0 : index
    %c0_79 = arith.constant 0 : index
    %204 = vector.load %arg7[%c0_77, %c0_78, %c0_79] : memref<1x8x32xf32, #tpu.memory_space<vmem>>, vector<1x8x32xf32>
    %205 = vector.shape_cast %204 : vector<1x8x32xf32> to vector<8x32xf32>
    %206 = vector.shape_cast %203 : vector<8x32xf32> to vector<1x8x32xf32>
    tpu.vector_store %arg7[%c0_77, %c0_78, %c0_79], %206 {strides = array<i32>} : memref<1x8x32xf32, #tpu.memory_space<vmem>>, vector<1x8x32xf32>,
    return
  }
  func.func @transform_0(%arg0: i32, %arg1: i32) -> (i32, i32, i32) {
    %c0_i32 = arith.constant 0 : i32
    %c0_i32_0 = arith.constant 0 : i32
    return %arg0, %arg1, %c0_i32 : i32, i32, i32
  }
  func.func @transform_1(%arg0: i32, %arg1: i32) -> (i32, i32, i32) {
    %c0_i32 = arith.constant 0 : i32
    %c0_i32_0 = arith.constant 0 : i32
    %c0_i32_1 = arith.constant 0 : i32
    return %arg0, %c0_i32, %c0_i32_0 : i32, i32, i32
  }
  func.func @transform_2(%arg0: i32, %arg1: i32) -> (i32, i32, i32) {
    %c0_i32 = arith.constant 0 : i32
    %c0_i32_0 = arith.constant 0 : i32
    %c0_i32_1 = arith.constant 0 : i32
    return %arg0, %c0_i32, %c0_i32_0 : i32, i32, i32
  }
  func.func @transform_3(%arg0: i32, %arg1: i32) -> (i32, i32) {
    %c0_i32 = arith.constant 0 : i32
    %c0_i32_0 = arith.constant 0 : i32
    %c0_i32_1 = arith.constant 0 : i32
    return %c0_i32, %c0_i32_0 : i32, i32
  }
  func.func @transform_4(%arg0: i32, %arg1: i32) -> (i32, i32) {
    %c0_i32 = arith.constant 0 : i32
    %c0_i32_0 = arith.constant 0 : i32
    %c0_i32_1 = arith.constant 0 : i32
    return %c0_i32, %c0_i32_0 : i32, i32
  }
  func.func @transform_5(%arg0: i32, %arg1: i32) -> (i32, i32, i32) {
    %c0_i32 = arith.constant 0 : i32
    %c0_i32_0 = arith.constant 0 : i32
    return %arg0, %arg1, %c0_i32 : i32, i32, i32
  }
  func.func @transform_6(%arg0: i32, %arg1: i32) -> (i32, i32, i32, i32) {
    %c0_i32 = arith.constant 0 : i32
    %c0_i32_0 = arith.constant 0 : i32
    %c0_i32_1 = arith.constant 0 : i32
    return %arg0, %c0_i32, %arg1, %c0_i32_0 : i32, i32, i32, i32
  }
}

</mosaic_0001>

<bundles_post_ra>
// kernel: tpu_custom_call.1
= control target key start
LH: loop header
LB: loop body
LE: loop exit
PB: predicated region body
PF: predicated region fallthrough
CT: control target
= control target key end

     0   :  { %s5175_s0 = inlined_call_operand.hbm [shape: f32[2,8,32], index: 0, kind: input, shape index: {}]   ;;  %s5176_s1 = inlined_call_operand.hbm [shape: f32[2,8,32], index: 1, kind: input, shape index: {}]   ;;  %s5177_s2 = inlined_call_operand.hbm [shape: f32[2,8,32], index: 2, kind: input, shape index: {}]   ;;  %s5178_s3 = inlined_call_operand.hbm [shape: f32[32,32], index: 3, kind: input, shape index: {}]   ;;  %s5179_s4 = inlined_call_operand.vmem [shape: f32[1,32], index: 4, kind: input, shape index: {}]   ;;  %s5180_s5 = inlined_call_operand.hbm [shape: f32[2,8,32], index: 5, kind: output, shape index: {0}]   ;;  %s5181_s6 = inlined_call_operand.hbm [shape: f32[2,4,8,8], index: 6, kind: output, shape index: {1}]  }
   0x1   :  { %5207 = sst [smem:[#allocation31_spill]] %s5176_s1 }
   0x2   :  { %5208 = sst [smem:[#allocation32_spill]] %s5179_s4 }
   0x3   :  { %5209 = sst [smem:[#allocation33_spill]] %s5180_s5 }
   0x4   :  { %5210 = sst [smem:[#allocation34_spill]] %s5181_s6 }
   0x5   :  { %12 = vsyncpa [#allocation3], 0 }
   0x6   :  { %14 = vsyncpa [#allocation3 + $0x1], 0 }
   0x7   :  { %15 = vsyncpa [#allocation6], 0 }
   0x8   :  { %17 = vsyncpa [#allocation6 + $0x1], 0 }
   0x9   :  { %18 = vsyncpa [#allocation9], 0 }
   0xa   :  { %19 = vsyncpa [#allocation4], 0 }
   0xb   :  { %21 = vsyncpa [#allocation4 + $0x1], 0 }
   0xc   :  { %22 = vsyncpa [#allocation12], 0 }
   0xd   :  { %24 = vsyncpa [#allocation12 + $0x1], 0  ;;  %s4056_s21 = smov 0   ;;  %s4058_s22 = smov 0  }
   0xe   :  { %s4060_s23 = smov 0   ;;  %s4062_s24 = smov 0  }
   0xf   :  { %s4064_s25 = smov 0   ;;  %s4066_s26 = smov 0  }
  0x10 LB: > { %5211 = sst [smem:[#allocation18_spill]] %s3979_s21  ;;  %s42_s27 = sadd.s32 1, %s3995_s25  ;;  %s3999_s26 = sphi %s4066_s26, %s30_s26   ;;  %s3995_s25 = sphi %s4064_s25, %s5259_s25   ;;  %s3991_s24 = sphi %s4062_s24, %s5258_s24   ;;  %s3987_s23 = sphi %s4060_s23, %s5262_s23   ;;  %s3983_s22 = sphi %s4058_s22, %s5261_s22   ;;  %s3979_s21 = sphi %s4056_s21, %s5260_s21  }
  0x11   : > { %5212 = sst [smem:[#allocation19_spill]] %s3995_s25  ;;  %s51_s28 = sadd.s32 1, %s3987_s23 }
  0x12   : > { %5213 = sst [smem:[#allocation20_spill]] %s3999_s26  ;;  %p44_p0 = scmp.ge.s32.totalorder %s42_s27, 2 }
  0x13   : > { %p5182_p1 = scmp.ne.s32.totalorder %s3987_s23, %s3983_s22  ;;  %p59_p2 = scmp.eq.s32.totalorder %s3999_s26, 0 }
  0x14   : > { %s5264_s27 = smov (%p44_p0, %s42_s27), 0  ;;  %p3603_p5 = scmp.lt.s32.totalorder %s3999_s26, 2 }
  0x15   : > { %5214 = sst [smem:[#allocation21_spill]] %s5264_s27  ;;  %p60_p4 = por %p59_p2, %p5182_p1 }
  0x16   : > { %s46_s29 = ssub.s32 %s3995_s25, %s5264_s27  ;;  %s5183_s30 = sand.u32 1, %s3987_s23  }
  0x17   : > { %p49_p6 = scmp.eq.s32.totalorder %s46_s29, 0  ;;  %s4103_s7 = sshll.u32 %s5183_s30, 3 }
  0x18   : > { %s4106_s8 = sshll.u32 %s3995_s25, 7  ;;  %p4108_p7 = pnand %p3603_p5, %p60_p4 }
  0x19   : > { %s4113_s10 = scalar_select %p49_p6, %s3987_s23, %s51_s28  }
  0x1a   : > { %s5215_s9 = scalar_select %p4108_p7, 1, 0 }
  0x1b   : > { %5216 = sst [smem:[#allocation22_spill]] %s4113_s10  ;;  %s273_s11 = sand.u32 1, %s3999_s26  }
  0x1c   : > { %s5217_s1 = sld [smem:[#allocation31_spill]]  ;;  %s277_s15 = scalar_lea.vmem [#allocation5], %s4103_s7 }
  0x1d   : > { %s284_s16 = sshll.u32 %s277_s15, 4  ;;  %s4125_s17 = scalar_lea.sflag [#allocation6], %s273_s11  ;;  %s4123_s16 = int_to_ptr.vmem [resolvable:$true] %s284_s16 }
  0x1e   : > { %p4131_p9 = pneg %p4108_p7 }
  0x20   : > { %s5218_s19 = scalar_select %p4131_p9, 1, 0 }
  0x22   : > { %s4120_s14 = scalar_lea.hbm %s5217_s1, %s4106_s8  ;;  %s3764_s29 = scalar_lea.hbm %s5217_s1, 256 }
  0x23   : > { %s3759_s18 = scalar_lea.hbm %s4120_s14, 128  ;;  %p3765_p12 = scmp.lt.u32.totalorder %s4120_s14, %s5217_s1 }
  0x24   : > { %p3760_p8 = scmp.ne.s32.totalorder %s4120_s14, %s3759_s18  ;;  %p3766_p13 = scmp.lt.u32.totalorder %s3764_s29, %s3759_s18 }
  0x25   : > { %p3768_p2 = scmp.lt.u32.totalorder %s3759_s18, %s4120_s14 }
  0x26   : > { %p3762_p10 = pnand %p4131_p9, %p3760_p8  ;;  %p3767_p0 = por %p3766_p13, %p3765_p12 }
  0x28   : > { %p3763_p11 = pneg %p3762_p10  ;;  %p3769_p4 = por %p3768_p2, %p3767_p0 }
  0x2a   : > { %p3770_p5 = pnand %p3769_p4, %p3763_p11 }
  0x2c   : > { %3773 = shalt.err (!%p3770_p5)
}
  0x2d   : > { %s3774_s11 = scalar_lea.vmem %s4123_s16, 128  ;;  %s4001_s15 = smov [#allocation5]  }
  0x2e   : > { %p3775_p6 = scmp.ne.s32.totalorder %s4123_s16, %s3774_s11  ;;  %s3779_s20 = sshll.u32 %s4001_s15, 4  ;;  %s3780_s20 = int_to_ptr.vmem [resolvable:$false] %s3779_s20 }
  0x2f   : > { %s3781_s28 = scalar_lea.vmem %s3780_s20, 256  ;;  %p3782_p3 = scmp.lt.s32.totalorder %s4123_s16, %s3780_s20 }
  0x30   : > { %p3777_p8 = pnand %p3775_p6, %p4131_p9  ;;  %p3783_p1 = scmp.lt.s32.totalorder %s3781_s28, %s3774_s11 }
  0x32   : > { %p3778_p10 = pneg %p3777_p8  ;;  %p3784_p12 = por %p3783_p1, %p3782_p3 }
  0x34   : > { %p3785_p13 = pnand %p3784_p12, %p3778_p10 }
  0x36   : > { %3788 = shalt.err (!%p3785_p13)
}
  0x37   : > { %3591 = dma.hbm_to_vmem [thread:$0]  (!%p4108_p7), %s4120_s14, 128, %s4123_s16, %s4125_s17  }
  0x38   : > { %s4156_s18 = sadd.s32 4294967295, %s3999_s26   ;;  %s3379_s29 = sadd.s32 4294967294, %s3999_s26  }
  0x39   : > { %p64_p1 = scmp.ne.s32.totalorder %s3983_s22, %s3979_s21  ;;  %p5189_p3 = scmp.eq.s32.totalorder %s4156_s18, 0 }
  0x3a   : > { %p184_p11 = scmp.eq.s32.totalorder %s4156_s18, 1  ;;  %p190_p0 = scmp.eq.s32.totalorder %s3379_s29, 1 }
  0x3b   : > { %p3380_p2 = scmp.ge.s32.totalorder %s3999_s26, 1  ;;  %p4166_p4 = por %p5189_p3, %p64_p1 }
  0x3c   : > { %p5220_p5 = scmp.ne.s32.totalorder %s3987_s23, %s3983_s22  ;;  %p4177_p8 = por %p190_p0, %p64_p1 }
  0x3d   : > { %s5219_s12 = scalar_select %p4166_p4, 1, 0 }
  0x3e   : > { %p4173_p6 = por %p184_p11, %p5220_p5  ;;  %p225_p10 = scmp.lt.s32.totalorder %s3999_s26, 3 }
  0x3f   : > { %s5222_s16 = scalar_select %p4177_p8, 1, 0 }
  0x40   : > { %s5221_s14 = scalar_select %p4173_p6, 1, 0 }
  0x41   : > { %5223 = sst [smem:[#allocation23_spill]] %s5222_s16  ;;  %p4182_p12 = pnand %p3380_p2, %p225_p10 }
  0x42   : > { %s4002_s11 = smov [#allocation8]   ;;  %s4200_s30 = scalar_lea.hbm %s5175_s0, %s4106_s8 }
  0x43   : > { %s5224_s13 = scalar_select %p4182_p12, 1, 0 }
  0x44   : > { %s237_s15 = sshll.u32 %s4002_s11, 4  ;;  %p3581_p13 = pneg %p4182_p12  ;;  %s4186_s15 = int_to_ptr.vmem [resolvable:$true] %s237_s15 }
  0x45   : > { %s258_s1 = scalar_lea.vmem [#allocation2], %s4103_s7  ;;  %s3789_s10 = scalar_lea.hbm %s5178_s3, 512 }
  0x46   : > { %p4192_p11 = pnand %p3581_p13, %p5189_p3  ;;  %s266_s27 = sshll.u32 %s258_s1, 4  ;;  %s4203_s27 = int_to_ptr.vmem [resolvable:$true] %s266_s27 }
  0x47   : > { %p3790_p1 = scmp.ne.s32.totalorder %s5178_s3, %s3789_s10  ;;  %p3796_p10 = scmp.lt.u32.totalorder %s3789_s10, %s5178_s3 }
  0x48   : > { %p3791_p0 = pneg %p4192_p11 }
  0x4a   : > { %p3792_p2 = pnand %p3791_p0, %p3790_p1 }
  0x4c   : > { %p3793_p5 = pneg %p3792_p2 }
  0x4e   : > { %p3798_p13 = pnand %p3796_p10, %p3793_p5 }
  0x50   : > { %3801 = shalt.err (!%p3798_p13)
}
  0x51   : > { %s3802_s1 = scalar_lea.vmem %s4186_s15, 512  ;;  %p3810_p4 = scmp.lt.s32.totalorder %s4186_s15, %s4186_s15 }
  0x52   : > { %p3803_p3 = scmp.ne.s32.totalorder %s4186_s15, %s3802_s1  ;;  %p3811_p12 = scmp.lt.s32.totalorder %s3802_s1, %s3802_s1 }
  0x54   : > { %p3805_p8 = pnand %p3803_p3, %p3791_p0  ;;  %p3812_p7 = por %p3811_p12, %p3810_p4 }
  0x56   : > { %p3806_p6 = pneg %p3805_p8 }
  0x58   : > { %p3813_p9 = pnand %p3812_p7, %p3806_p6 }
  0x5a   : > { %3816 = shalt.err (!%p3813_p9)
}
  0x5b   : > { %s4003_s25 = smov 128   ;;  %s4004_s26 = smov 8  }
  0x5c   : > { %3584 = dma.hbm_to_vmem [thread:$0]  (!%p4192_p11), %s5178_s3, 512, %s4186_s15, [#allocation9], %s4003_s25, %s4003_s25, %s4004_s26  }
  0x5d   : > { %s5226_s11 = sand.u32 1, %s3987_s23   ;;  %s3817_s29 = scalar_lea.hbm %s4200_s30, 128 }
  0x5e   : > { %s255_s28 = scalar_lea.sflag [#allocation3], %s5226_s11  ;;  %p3818_p7 = scmp.ne.s32.totalorder %s4200_s30, %s3817_s29 }
  0x5f   : > { %p5227_p9 = scmp.ne.s32.totalorder %s5218_s19, 0  ;;  %s3822_s5 = scalar_lea.hbm %s5175_s0, 256 }
  0x60   : > { %p3823_p6 = scmp.lt.u32.totalorder %s4200_s30, %s5175_s0  ;;  %p3824_p8 = scmp.lt.u32.totalorder %s3822_s5, %s3817_s29 }
  0x61   : > { %p3820_p3 = pnand %p3818_p7, %p5227_p9  ;;  %p3826_p1 = scmp.lt.u32.totalorder %s3817_s29, %s4200_s30 }
  0x62   : > { %p3825_p12 = por %p3824_p8, %p3823_p6 }
  0x63   : > { %p3821_p4 = pneg %p3820_p3 }
  0x64   : > { %p3827_p0 = por %p3826_p1, %p3825_p12 }
  0x66   : > { %p3828_p11 = pnand %p3827_p0, %p3821_p4 }
  0x68   : > { %3831 = shalt.err (!%p3828_p11)
}
  0x69   : > { %s3832_s15 = scalar_lea.vmem %s4203_s27, 128  ;;  %s4005_s21 = smov [#allocation2]  }
  0x6a   : > { %p3833_p2 = scmp.ne.s32.totalorder %s4203_s27, %s3832_s15  ;;  %s3837_s20 = sshll.u32 %s4005_s21, 4  ;;  %s3838_s20 = int_to_ptr.vmem [resolvable:$false] %s3837_s20 }
  0x6b   : > { %s3839_s4 = scalar_lea.vmem %s3838_s20, 256  ;;  %p3840_p13 = scmp.lt.s32.totalorder %s4203_s27, %s3838_s20 }
  0x6c   : > { %p3835_p5 = pnand %p3833_p2, %p5227_p9  ;;  %p3841_p7 = scmp.lt.s32.totalorder %s3839_s4, %s3832_s15 }
  0x6e   : > { %p3836_p10 = pneg %p3835_p5  ;;  %p3842_p3 = por %p3841_p7, %p3840_p13 }
  0x70   : > { %p3843_p6 = pnand %p3842_p3, %p3836_p10 }
  0x72   : > { %3846 = shalt.err (!%p3843_p6)
}
  0x73   : > { %p5228_p4 = scmp.ne.s32.totalorder %s5215_s9, 0  ;;  %s4253_s25 = scalar_lea.hbm %s5177_s2, %s4106_s8 }
  0x74   : > { %s295_s26 = scalar_lea.vmem [#allocation7], %s4103_s7  ;;  %s3847_s16 = scalar_lea.hbm %s4253_s25, 128 }
  0x75   : > { %3588 = dma.hbm_to_vmem [thread:$0]  (!%p5228_p4), %s4200_s30, 128, %s4203_s27, %s255_s28  }
  0x76   : > { %s302_s10 = sshll.u32 %s295_s26, 4  ;;  %p3848_p8 = scmp.ne.s32.totalorder %s4253_s25, %s3847_s16  ;;  %s303_s10 = int_to_ptr.vmem [resolvable:$true] %s302_s10 }
  0x77   : > { %s3852_s27 = scalar_lea.hbm %s5177_s2, 256  ;;  %p3853_p0 = scmp.lt.u32.totalorder %s4253_s25, %s5177_s2 }
  0x78   : > { %p3850_p12 = pnand %p3848_p8, %p5227_p9  ;;  %p3854_p11 = scmp.lt.u32.totalorder %s3852_s27, %s3847_s16 }
  0x79   : > { %p3856_p5 = scmp.lt.u32.totalorder %s3847_s16, %s4253_s25 }
  0x7a   : > { %p3851_p1 = pneg %p3850_p12  ;;  %p3855_p2 = por %p3854_p11, %p3853_p0 }
  0x7c   : > { %p3857_p10 = por %p3856_p5, %p3855_p2 }
  0x7e   : > { %p3858_p13 = pnand %p3857_p10, %p3851_p1 }
  0x80   : > { %3861 = shalt.err (!%p3858_p13)
}
  0x81   : > { %s3862_s7 = scalar_lea.vmem %s303_s10, 128  ;;  %s4006_s8 = smov [#allocation7]  }
  0x82   : > { %p3863_p7 = scmp.ne.s32.totalorder %s303_s10, %s3862_s7  ;;  %s3867_s1 = sshll.u32 %s4006_s8, 4  ;;  %s3868_s1 = int_to_ptr.vmem [resolvable:$false] %s3867_s1 }
  0x83   : > { %s3869_s15 = scalar_lea.vmem %s3868_s1, 256  ;;  %p3870_p8 = scmp.lt.s32.totalorder %s303_s10, %s3868_s1 }
  0x84   : > { %p3865_p3 = pnand %p3863_p7, %p5227_p9  ;;  %p3871_p12 = scmp.lt.s32.totalorder %s3869_s15, %s3862_s7 }
  0x86   : > { %p3866_p6 = pneg %p3865_p3  ;;  %p3872_p4 = por %p3871_p12, %p3870_p8 }
  0x88   : > { %p3873_p0 = pnand %p3872_p4, %p3866_p6 }
  0x8a   : > { %3876 = shalt.err (!%p3873_p0)
}
  0x8b   : > { %p5229_p11 = scmp.ne.s32.totalorder %s5215_s9, 0  ;;  %p5230_p1 = scmp.ne.s32.totalorder %s5224_s13, 0 }
  0x8d   : > { %3594 = dma.hbm_to_vmem [thread:$0]  (!%p5229_p11), %s4253_s25, 128, %s303_s10, %s4125_s17  }
  0x8e   : > { %311 = sbr.rel (%p5230_p1) target bundleno = 2024 (0x7e8), region = 40 }
  0x95   : > { %s4277_s19 = sand.u32 1, %s3983_s22   ;;  %p5231_p9 = scmp.ne.s32.totalorder %s5219_s12, 0 }
  0x96   : > { %s4280_s21 = sshll.u32 %s4277_s19, 3  ;;  %s314_s20 = scalar_lea.sflag [#allocation3], %s4277_s19 }
  0x97   : > { %s317_s4 = scalar_lea.vmem [#allocation2], %s4280_s21 }
  0x98   : > { %3958 = dma.done.wait (%p5231_p9), %s314_s20, 128  }
  0x99   : > { %3960 = vsyncadd (%p5231_p9), %s314_s20, 4294967168  ;;  %s322_s9 = sand.u32 1, %s4156_s18   ;;  %s326_s13 = scalar_lea.vmem [#allocation5], %s4280_s21 }
  0x9a   : > { %s323_s17 = scalar_lea.sflag [#allocation6], %s322_s9 }
  0x9b   : > { %3962 = dma.done.wait (%p5231_p9), %s323_s17, 256  }
  0x9c   : > { %3964 = vsyncadd (%p5231_p9), %s323_s17, 4294967040  ;;  %s335_s5 = scalar_lea.vmem [#allocation7], %s4280_s21  ;;  %p5232_p4 = scmp.eq.s32.totalorder %s4156_s18, 0 }
  0x9e   : > { %3966 = dma.done.wait (%p5232_p4), [#allocation9], 512   ;;  %p5233_p2 = pmov %p5232_p4 }
  0x9f   : > { %v4007_v0 = vmov 0.0   ;;  %vm4008_vm0 = vmmov 0   ;;  %vm386_vm1 = vcmask 64512   ;;  %v384_v1 = vld [vmem:[%s326_s13] sm:$0xff]  ;;  %s4009_s12 = smov 120   ;;  %v383_v2 = vld [vmem:[%s317_s4] sm:$0xff]  ;;  %v473_v13 = vlaneseq }
  0xa0   : > { %3968 = vsyncadd (%p5233_p2), [#allocation9], 4294966784  ;;  %3510 = vmatprep.subr.mxu0 %v4007_v0  ;;  %3512 = vmatprep.mubr.msk.f32.mxu0 %vm4008_vm0, %v4007_v0  ;;  %s4010_s18 = smov 112   ;;  %s4011_s6 = smov 104   ;;  %v4012_v47 = vmov 1966171168  }
  0xa1   : > { %3520 = vmatprep.subr.mxu1 %v4007_v0  ;;  %3522 = vmatprep.mubr.msk.f32.mxu1 %vm4008_vm0, %v4007_v0  ;;  %v474_v14 = vshrl.u32 %v473_v13, 7  ;;  %v847_v15 = vand.u32 127, %v473_v13  ;;  %v471_v48 = vunpack.c.l.s4 %v4012_v47  ;;  %s3395_s25 = sshll.u32 %s4277_s19, 5  ;;  %s4015_s10 = smov 8  }
  0xa2   : > { %1062 = vrot.lane.b32.xlu0 %v384_v1, %s4009_s12  ;;  %3511 = vmatpush3.xpose.msk.msra.mxu0 %vm386_vm1, %v384_v1  ;;  %s5055_s26 = scalar_lea.vmem [#allocation11], %s3395_s25  ;;  %s4016_s16 = smov 16  }
  0xa3   : > { %1733 = vrot.lane.b32.xlu1 %v384_v1, %s4010_s18  ;;  %3515 = vmatprep.subr.mxu0 %v4007_v0  ;;  %v4331_v16 = vsub.s32 %v847_v15, %v474_v14  ;;  %v4342_v29 = vsub.s32 0, %v474_v14  ;;  %v4344_v30 = vsub.s32 1, %v474_v14  ;;  %v4352_v35 = vsub.s32 4, %v474_v14  ;;  %s4017_s11 = smov 24   ;;  %s3488_s29 = sshll.u32 %s3991_s24, 9 }
  0xa4   : > { %v4356_v37 = vsub.s32 6, %v474_v14  ;;  %v4358_v38 = vsub.s32 2, %v474_v14  ;;  %v4364_v41 = vsub.s32 3, %v474_v14  ;;  %v4368_v43 = vsub.s32 5, %v474_v14  ;;  %s3208_s27 = sshll.u32 %s5055_s26, 4  ;;  %s5248_s7 = sld [smem:[#allocation34_spill]]  ;;  %s5090_s27 = int_to_ptr.vmem [resolvable:$true] %s3208_s27 }
  0xa5   : > { %3513 = vmatmul.mubr.msk.f32.vlgmr.msra.gmra.mrb[0].mxu0 %vm386_vm1, %v383_v2  ;;  %5234 = vst [vmem:[#allocation24_spill] sm:$0xff] %v4331_v16  ;;  %v4372_v45 = vsub.s32 7, %v474_v14  ;;  %v472_v49 = vunpack.c.0.s8 %v471_v48  ;;  %s3180_s1 = scalar_lea.sflag [#allocation12], %s4277_s19  ;;  %s3877_s15 = scalar_lea.vmem %s5090_s27, 512 }
  0xa6   : > { %1060 = vrot.lane.b32.xlu0 %v383_v2, %s4009_s12  ;;  %3517 = vmatprep.mubr.msk.f32.mxu0 %vm4008_vm0, %v4007_v0  ;;  %p3878_p5 = scmp.ne.s32.totalorder %s5090_s27, %s3877_s15  ;;  %p5249_p10 = scmp.ne.s32.totalorder %s5221_s14, 0 }
  0xa7   : > { %1731 = vrot.lane.b32.xlu1 %v383_v2, %s4010_s18  ;;  %v4376_v50 = vsub.s32 %v472_v49, %v474_v14  ;;  %s4018_s20 = smov [#allocation11]  }
  0xa8   : > { %p3879_p13 = pnand %p3878_p5, %p5249_p10  ;;  %s3881_s4 = sshll.u32 %s4018_s20, 4  ;;  %s3882_s4 = int_to_ptr.vmem [resolvable:$false] %s3881_s4 }
  0xa9   : > { %s3883_s9 = scalar_lea.vmem %s3882_s4, 1024  ;;  %p3884_p3 = scmp.lt.s32.totalorder %s5090_s27, %s3882_s4 }
  0xaa   : > { %2403 = vrot.lane.b32.xlu0 %v384_v1, %s4011_s6  ;;  %s5088_s8 = scalar_lea.hbm %s5248_s7, %s3488_s29  ;;  %p3880_p7 = pneg %p3879_p13 }
  0xab   : > { %2401 = vrot.lane.b32.xlu1 %v383_v2, %s4011_s6  ;;  %p3885_p6 = scmp.lt.s32.totalorder %s3883_s9, %s3877_s15 }
  0xad   : > { %p3886_p8 = por %p3885_p6, %p3884_p3 }
  0xaf   : > { %p3887_p12 = pnand %p3886_p8, %p3880_p7 }
 0x114   : > { %v1063_v3 = vpop.permute.xlu0 %1062 }
 0x115   : > { %3521 = vmatpush3.xpose.msk.msra.mxu1 %vm386_vm1, %v1063_v3  ;;  %v1734_v4 = vpop.permute.xlu1 %1733 }
 0x116   : > { %3530 = vmatprep.subr.mxu1 %v4007_v0 }
 0x118   : > { %v1061_v5 = vpop.permute.xlu0 %1060 }
 0x119   : > { %3523 = vmatmul.mubr.msk.f32.vlgmr.msra.gmra.mrb[0].mxu1 %vm386_vm1, %v1061_v5  ;;  %v1732_v6 = vpop.permute.xlu1 %1731 }
 0x11a   : > { %3531 = vmatpush3.xpose.msk.msra.mxu1 %vm386_vm1, %v1734_v4  ;;  %3532 = vmatprep.mubr.msk.f32.mxu1 %vm4008_vm0, %v4007_v0 }
 0x11b   : > { %3540 = vmatprep.subr.mxu1 %v4007_v0 }
 0x11c   : > { %v2404_v7 = vpop.permute.xlu0 %2403 }
 0x11d   : > { %3533 = vmatmul.mubr.msk.f32.vlgmr.msra.gmra.mrb[2].mxu1 %vm386_vm1, %v1732_v6  ;;  %v2402_v8 = vpop.permute.xlu1 %2401 }
 0x11e   : > { %3541 = vmatpush3.xpose.msk.msra.mxu1 %vm386_vm1, %v2404_v7  ;;  %3542 = vmatprep.mubr.msk.f32.mxu1 %vm4008_vm0, %v4007_v0 }
 0x121   : > { %3543 = vmatmul.mubr.msk.f32.vlgmr.msra.gmra.mrb[4].mxu1 %vm386_vm1, %v2402_v8 }
 0x122   : > { %3558 = vmatprep.mubr.msk.f32.mxu1 %vm4008_vm0, %v4007_v0 }
 0x178   : > { %v459_v9 = vpop.f32.mrb[0].mxu0 }
 0x179   : > { %v463_v10 = vmul.f32 0.35355338, %v459_v9  ;;  %v3514_v11 = vpop.f32.mrb[1].mxu0 }
 0x17b   : > { %v464_v12 = vsel %vm386_vm1, %v463_v10, -inf }
 0x17c   : > { %465 = vmax.xlane.f32.xlu0 %v464_v12 }
 0x1ec   : > { %v1134_v17 = vpop.f32.mrb[0].mxu1 }
 0x1ed   : > { %v1138_v18 = vmul.f32 0.35355338, %v1134_v17  ;;  %v3524_v19 = vpop.f32.mrb[1].mxu1 }
 0x1ef   : > { %v1139_v20 = vsel %vm386_vm1, %v1138_v18, -inf }
 0x1f0   : > { %v1805_v21 = vpop.f32.mrb[2].mxu1  ;;  %1140 = vmax.xlane.f32.xlu0 %v1139_v20 }
 0x1f1   : > { %v4334_v22 = vmul.f32 0.35355338, %v1805_v21  ;;  %v3534_v23 = vpop.f32.mrb[3].mxu1 }
 0x1f3   : > { %v1810_v24 = vsel %vm386_vm1, %v4334_v22, -inf }
 0x1f4   : > { %v2475_v25 = vpop.f32.mrb[4].mxu1  ;;  %1811 = vmax.xlane.f32.xlu0 %v1810_v24 }
 0x1f5   : > { %v4338_v26 = vmul.f32 0.35355338, %v2475_v25  ;;  %v3544_v27 = vpop.f32.mrb[5].mxu1 }
 0x1f7   : > { %v2480_v28 = vsel %vm386_vm1, %v4338_v26, -inf }
 0x1f8   : > { %2481 = vmax.xlane.f32.xlu0 %v2480_v28 }
 0x209   : > { %v466_v31 = vpop.xlane.xlu0 %465 }
 0x20a   : > { %v4346_v32 = vsub.f32 %v463_v10, %v466_v31 }
 0x20c   : > { %5235 = vst [vmem:[#allocation25_spill] sm:$0xff] %v4346_v32  ;;  %v528_v33 = vrot.slane %v4346_v32, %v4344_v30  ;;  %v521_v34 = vrot.slane %v4346_v32, %v4342_v29  ;;  %v549_v36 = vrot.slane %v4346_v32, %v4352_v35  ;;  %v563_v39 = vrot.slane %v4346_v32, %v4356_v37 }
 0x20d   : > { %v535_v40 = vrot.slane %v4346_v32, %v4358_v38  ;;  %v542_v42 = vrot.slane %v4346_v32, %v4364_v41  ;;  %v556_v44 = vrot.slane %v4346_v32, %v4368_v43  ;;  %v570_v46 = vrot.slane %v4346_v32, %v4372_v45 }
 0x20e   : > { %722 = vbcast.lane.b32.xlu0 %v528_v33, 256  ;;  %523 = vbcast.lane.b32.xlu1 %v521_v34, 256  ;;  %v476_v51 = vrot.slane %v4346_v32, %v4376_v50  ;;  %v469_v59 = vcombine.high %v4346_v32, %v4346_v32 }
 0x210   : > { %v484_v54 = vcombine.high %v476_v51, %v476_v51  ;;  %v483_v2 = vrot.slane %v469_v59, %v4376_v50 }
 0x212   : > { %743 = vbcast.lane.b32.xlu0 %v549_v36, 256  ;;  %530 = vbcast.lane.b32.xlu1 %v528_v33, 256  ;;  %v506_v58 = vrot.slane %v484_v54, %v4376_v50  ;;  %v485_v7 = vcombine.high %v483_v2, %v483_v2  ;;  %v492_v33 = vrot.slane %v476_v51, %v4376_v50 }
 0x214   : > { %v581_v63 = vrot.slane %v506_v58, %v4342_v29  ;;  %v516_v1 = vcombine.high %v506_v58, %v506_v58  ;;  %v513_v12 = vrot.slane %v485_v7, %v4376_v50 }
 0x216   : > { %757 = vbcast.lane.b32.xlu0 %v563_v39, 256  ;;  %537 = vbcast.lane.b32.xlu1 %v535_v40, 256  ;;  %v589_v6 = vrot.slane %v516_v1, %v4342_v29  ;;  %v517_v21 = vcombine.high %v513_v12, %v513_v12 }
 0x218   : > { %v605_v25 = vrot.slane %v517_v21, %v4342_v29 }
 0x21a   : > { %544 = vbcast.lane.b32.xlu1 %v542_v42, 256 }
 0x21e   : > { %551 = vbcast.lane.b32.xlu1 %v549_v36, 256  ;;  %v577_v36 = vrot.slane %v492_v33, %v4342_v29 }
 0x222   : > { %558 = vbcast.lane.b32.xlu1 %v556_v44, 256 }
 0x226   : > { %565 = vbcast.lane.b32.xlu1 %v563_v39, 256  ;;  %v514_v39 = vcombine.high %v492_v33, %v492_v33 }
 0x22a   : > { %572 = vbcast.lane.b32.xlu1 %v570_v46, 256 }
 0x22e   : > { %715 = vbcast.lane.b32.xlu1 %v521_v34, 256 }
 0x232   : > { %729 = vbcast.lane.b32.xlu1 %v535_v40, 256  ;;  %v585_v40 = vrot.slane %v514_v39, %v4342_v29 }
 0x236   : > { %736 = vbcast.lane.b32.xlu1 %v542_v42, 256 }
 0x23a   : > { %750 = vbcast.lane.b32.xlu1 %v556_v44, 256 }
 0x23e   : > { %764 = vbcast.lane.b32.xlu1 %v570_v46, 256  ;;  %v499_v46 = vrot.slane %v483_v2, %v4376_v50 }
 0x240   : > { %v593_v51 = vrot.slane %v499_v46, %v4342_v29 }
 0x27d   : > { %v1141_v52 = vpop.xlane.xlu0 %1140 }
 0x27e   : > { %v4380_v53 = vsub.f32 %v1138_v18, %v1141_v52  ;;  %v597_v18 = vrot.slane %v513_v12, %v4342_v29 }
 0x280   : > { %5236 = vst [vmem:[#allocation26_spill] sm:$0xff] %v4380_v53  ;;  %v4382_v55 = vpop.permute.xlu1 %523  ;;  %v1203_v56 = vrot.slane %v4380_v53, %v4344_v30  ;;  %v1196_v57 = vrot.slane %v4380_v53, %v4342_v29  ;;  %v1217_v61 = vrot.slane %v4380_v53, %v4364_v41  ;;  %v1210_v62 = vrot.slane %v4380_v53, %v4358_v38 }
 0x281   : > { %v1231_v4 = vrot.slane %v4380_v53, %v4368_v43  ;;  %v1224_v5 = vrot.slane %v4380_v53, %v4352_v35  ;;  %v1238_v9 = vrot.slane %v4380_v53, %v4356_v37  ;;  %v1245_v17 = vrot.slane %v4380_v53, %v4372_v45  ;;  %v1812_v44 = vpop.xlane.xlu0 %1811 }
 0x282   : > { %1205 = vbcast.lane.b32.xlu1 %v1203_v56, 256  ;;  %1198 = vbcast.lane.b32.xlu0 %v1196_v57, 256  ;;  %vm614_vm6 = vcmp.ge.f32.partialorder %v577_v36, %v4382_v55  ;;  %v4430_v48 = vsub.f32 %v4334_v22, %v1812_v44  ;;  %v515_v55 = vcombine.high %v499_v46, %v499_v46 }
 0x283   : > { %v3398_v42 = vsel %vm614_vm6, 1.0, %v4007_v0 }
 0x284   : > { %v531_v60 = vpop.permute.xlu1 %530  ;;  %v638_v47 = vsel %vm386_vm1, %v3398_v42, 0.0  ;;  %5237 = vst [vmem:[#allocation27_spill] sm:$0xff] %v4430_v48  ;;  %v1874_v54 = vrot.slane %v4430_v48, %v4344_v30  ;;  %v1881_v22 = vrot.slane %v4430_v48, %v4358_v38  ;;  %v601_v58 = vrot.slane %v515_v55, %v4342_v29 }
 0x285   : > { %vm615_vm2 = vcmp.ge.f32.partialorder %v581_v63, %v531_v60  ;;  %v1888_v60 = vrot.slane %v4430_v48, %v4364_v41  ;;  %v1895_v12 = vrot.slane %v4430_v48, %v4352_v35 }
 0x286   : > { %1219 = vbcast.lane.b32.xlu1 %v1217_v61, 256  ;;  %1212 = vbcast.lane.b32.xlu0 %v1210_v62, 256  ;;  %v3399_v10 = vsel %vm615_vm2, 1.0, %v4007_v0 }
 0x287   : > { %v4407_v13 = vmul.f32 %v3399_v10, %v581_v63  ;;  %v641_v34 = vsel %vm386_vm1, %v3399_v10, 0.0 }
 0x288   : > { %v538_v3 = vpop.permute.xlu1 %537 }
 0x289   : > { %vm616_vm7 = vcmp.ge.f32.partialorder %v585_v40, %v538_v3  ;;  %v2482_v3 = vpop.xlane.xlu0 %2481 }
 0x28a   : > { %1233 = vbcast.lane.b32.xlu1 %v1231_v4, 256  ;;  %1226 = vbcast.lane.b32.xlu0 %v1224_v5, 256  ;;  %v3400_v49 = vsel %vm616_vm7, 1.0, %v4007_v0 }
 0x28b   : > { %v644_v52 = vsel %vm386_vm1, %v3400_v49, 0.0 }
 0x28c   : > { %v545_v8 = vpop.permute.xlu1 %544 }
 0x28d   : > { %vm617_vm3 = vcmp.ge.f32.partialorder %v589_v6, %v545_v8 }
 0x28e   : > { %1397 = vbcast.lane.b32.xlu1 %v1203_v56, 256  ;;  %1240 = vbcast.lane.b32.xlu0 %v1238_v9, 256  ;;  %v3401_v11 = vsel %vm617_vm3, 1.0, %v4007_v0 }
 0x28f   : > { %v4409_v14 = vmul.f32 %v3401_v11, %v589_v6  ;;  %v647_v56 = vsel %vm386_vm1, %v3401_v11, 0.0  ;;  %v4457_v6 = vrot.slane %v4380_v53, %v4376_v50 }
 0x290   : > { %v552_v15 = vpop.permute.xlu1 %551 }
 0x291   : > { %vm618_vm8 = vcmp.ge.f32.partialorder %v593_v51, %v552_v15  ;;  %v4461_v7 = vrot.slane %v4457_v6, %v4376_v50 }
 0x292   : > { %1404 = vbcast.lane.b32.xlu1 %v1210_v62, 256  ;;  %1247 = vbcast.lane.b32.xlu0 %v1245_v17, 256  ;;  %v1902_v62 = vrot.slane %v4430_v48, %v4368_v43 }
 0x293   : > { %v1189_v10 = vcombine.high %v4461_v7, %v4461_v7 }
 0x294   : > { %v559_v19 = vpop.permute.xlu1 %558 }
 0x295   : > { %vm619_vm4 = vcmp.ge.f32.partialorder %v597_v18, %v559_v19  ;;  %v1260_v15 = vrot.slane %v1189_v10, %v4342_v29  ;;  %v670_v19 = vmul.f32 %v3398_v42, %v577_v36 }
 0x296   : > { %1425 = vbcast.lane.b32.xlu1 %v1231_v4, 256  ;;  %1390 = vbcast.lane.b32.xlu0 %v1196_v57, 256  ;;  %v3403_v20 = vsel %vm619_vm4, 1.0, %v4007_v0  ;;  %v3402_v57 = vsel %vm618_vm8, 1.0, %v4007_v0  ;;  %v4451_v4 = vpop.permute.xlu0 %722 }
 0x297   : > { %v4415_v23 = vmul.f32 %v3403_v20, %v597_v18  ;;  %v650_v59 = vsel %vm386_vm1, %v3402_v57, 0.0  ;;  %v1909_v18 = vrot.slane %v4430_v48, %v4356_v37  ;;  %v674_v33 = vmul.f32 %v3402_v57, %v593_v51 }
 0x298   : > { %v566_v24 = vpop.permute.xlu1 %565 }
 0x299   : > { %vm620_vm9 = vcmp.ge.f32.partialorder %v601_v58, %v566_v24  ;;  %v1916_v24 = vrot.slane %v4430_v48, %v4372_v45 }
 0x29a   : > { %1411 = vbcast.lane.b32.xlu0 %v1217_v61, 256  ;;  %v653_v61 = vsel %vm386_vm1, %v3403_v20, 0.0  ;;  %v3404_v63 = vsel %vm620_vm9, 1.0, %v4007_v0 }
 0x29b   : > { %v656_v1 = vsel %vm386_vm1, %v3404_v63, 0.0  ;;  %v676_v36 = vmul.f32 %v3404_v63, %v601_v58 }
 0x29c   : > { %v573_v27 = vpop.permute.xlu1 %572 }
 0x29d   : > { %vm621_vm5 = vcmp.ge.f32.partialorder %v605_v25, %v573_v27  ;;  %v672_v27 = vmul.f32 %v3400_v49, %v585_v40  ;;  %v696_v39 = vsel %vm386_vm1, %v676_v36, 0.0  ;;  %v4489_v40 = vsub.f32 %v4338_v26, %v2482_v3 }
 0x29e   : > { %1418 = vbcast.lane.b32.xlu0 %v1224_v5, 256  ;;  %v3405_v28 = vsel %vm621_vm5, 1.0, %v4007_v0  ;;  %v4453_v5 = vpop.permute.xlu0 %743 }
 0x29f   : > { %v4419_v31 = vmul.f32 %v3405_v28, %v605_v25  ;;  %v659_v2 = vsel %vm386_vm1, %v3405_v28, 0.0  ;;  %v678_v25 = vsel %vm386_vm1, %v670_v19, 0.0  ;;  %v684_v28 = vsel %vm386_vm1, %v672_v27, 0.0  ;;  %5238 = vst [vmem:[#allocation28_spill] sm:$0xff] %v4489_v40 }
 0x2a0   : > { %v2544_v42 = vrot.slane %v4489_v40, %v4344_v30  ;;  %v4495_v44 = vrot.slane %v4489_v40, %v4358_v38  ;;  %v4500_v46 = vrot.slane %v4489_v40, %v4364_v41  ;;  %v4505_v26 = vrot.slane %v4489_v40, %v4368_v43  ;;  %v4513_v49 = vpop.permute.xlu1 %715 }
 0x2a1   : > { %v4510_v38 = vrot.slane %v4489_v40, %v4372_v45  ;;  %v2565_v51 = vrot.slane %v4489_v40, %v4352_v35  ;;  %v681_v45 = vsel %vm386_vm1, %v4407_v13, 0.0  ;;  %v687_v35 = vsel %vm386_vm1, %v4409_v14, 0.0 }
 0x2a2   : > { %1432 = vbcast.lane.b32.xlu0 %v1238_v9, 256  ;;  %v4463_v8 = vpop.permute.xlu0 %757  ;;  %v1867_v9 = vrot.slane %v4430_v48, %v4342_v29  ;;  %v1144_v14 = vcombine.high %v4380_v53, %v4380_v53 }
 0x2a4   : > { %v4519_v43 = vpop.permute.xlu1 %729 }
 0x2a6   : > { %1439 = vbcast.lane.b32.xlu0 %v1245_v17, 256 }
 0x2a8   : > { %v4527_v55 = vpop.permute.xlu1 %736 }
 0x2ac   : > { %v4535_v57 = vpop.permute.xlu1 %750 }
 0x2b0   : > { %v4541_v13 = vpop.permute.xlu1 %764 }
 0x2ba   : > { %642 = vadd.xlane.f32.xlu1 %v641_v34  ;;  %v690_v34 = vsel %vm386_vm1, %v674_v33, 0.0 }
 0x2c5   : > { %639 = vadd.xlane.f32.xlu0 %v638_v47 }
 0x2c9   : > { %645 = vadd.xlane.f32.xlu0 %v644_v52 }
 0x2cb   : > { %1876 = vbcast.lane.b32.xlu1 %v1874_v54, 256 }
 0x2cd   : > { %648 = vadd.xlane.f32.xlu0 %v647_v56 }
 0x2cf   : > { %1883 = vbcast.lane.b32.xlu1 %v1881_v22, 256 }
 0x2d1   : > { %651 = vadd.xlane.f32.xlu0 %v650_v59 }
 0x2d3   : > { %1890 = vbcast.lane.b32.xlu1 %v1888_v60, 256 }
 0x2d5   : > { %654 = vadd.xlane.f32.xlu0 %v653_v61 }
 0x2d7   : > { %1904 = vbcast.lane.b32.xlu1 %v1902_v62, 256 }
 0x2d9   : > { %657 = vadd.xlane.f32.xlu0 %v656_v1 }
 0x2db   : > { %2068 = vbcast.lane.b32.xlu1 %v1874_v54, 256  ;;  %v2579_v54 = vrot.slane %v4489_v40, %v4356_v37  ;;  %v699_v37 = vsel %vm386_vm1, %v4419_v31, 0.0  ;;  %v1159_v31 = vcombine.high %v4457_v6, %v4457_v6  ;;  %v1252_v6 = vrot.slane %v4461_v7, %v4342_v29 }
 0x2dd   : > { %660 = vadd.xlane.f32.xlu0 %v659_v2  ;;  %v4560_v3 = vrot.slane %v1159_v31, %v4376_v50 }
 0x2f3   : > { %1869 = vbcast.lane.b32.xlu0 %v1867_v9, 256 }
 0x2f4   : > { %v4469_v11 = vpop.permute.xlu0 %1198 }
 0x2f5   : > { %vm1289_vm12 = vcmp.ge.f32.partialorder %v1252_v6, %v4469_v11 }
 0x2f6   : > { %v4583_v36 = vsel %vm1289_vm12, 1.0, %v4007_v0 }
 0x2f7   : > { %1897 = vbcast.lane.b32.xlu0 %v1895_v12, 256 }
 0x2f8   : > { %v1213_v17 = vpop.permute.xlu0 %1212 }
 0x2f9   : > { %vm1291_vm10 = vcmp.ge.f32.partialorder %v1260_v15, %v1213_v17  ;;  %v2537_v17 = vrot.slane %v4489_v40, %v4342_v29 }
 0x2fa   : > { %v4477_v20 = vsel %vm1291_vm10, 1.0, %v4007_v0 }
 0x2fb   : > { %1911 = vbcast.lane.b32.xlu0 %v1909_v18, 256  ;;  %v4480_v21 = vmul.f32 %v4477_v20, %v1260_v15 }
 0x2fc   : > { %v1227_v47 = vpop.permute.xlu0 %1226 }
 0x2ff   : > { %679 = vadd.xlane.f32.xlu1 %v678_v25  ;;  %1918 = vbcast.lane.b32.xlu0 %v1916_v24, 256 }
 0x300   : > { %v1241_v30 = vpop.permute.xlu0 %1240 }
 0x303   : > { %685 = vadd.xlane.f32.xlu1 %v684_v28  ;;  %2061 = vbcast.lane.b32.xlu0 %v1867_v9, 256 }
 0x304   : > { %v4515_v41 = vpop.permute.xlu0 %1247 }
 0x307   : > { %691 = vadd.xlane.f32.xlu1 %v690_v34  ;;  %2075 = vbcast.lane.b32.xlu0 %v1881_v22, 256  ;;  %v693_v22 = vsel %vm386_vm1, %v4415_v23, 0.0  ;;  %v1158_v23 = vrot.slane %v1144_v14, %v4376_v50 }
 0x308   : > { %v4521_v52 = vpop.permute.xlu0 %1390 }
 0x309   : > { %v1174_v1 = vrot.slane %v1158_v23, %v4376_v50  ;;  %v1160_v33 = vcombine.high %v1158_v23, %v1158_v23 }
 0x30b   : > { %697 = vadd.xlane.f32.xlu1 %v696_v39  ;;  %2082 = vbcast.lane.b32.xlu0 %v1888_v60, 256  ;;  %v4547_v60 = vpop.permute.xlu1 %1205  ;;  %v1268_v9 = vrot.slane %v1174_v1, %v4342_v29  ;;  %v1190_v10 = vcombine.high %v1174_v1, %v1174_v1  ;;  %v1188_v11 = vrot.slane %v1160_v33, %v4376_v50 }
 0x30c   : > { %v4529_v56 = vpop.permute.xlu0 %1411 }
 0x30d   : > { %vm1293_vm11 = vcmp.ge.f32.partialorder %v1268_v9, %v1227_v47  ;;  %v1276_v19 = vrot.slane %v1190_v10, %v4342_v29  ;;  %v1192_v23 = vcombine.high %v1188_v11, %v1188_v11 }
 0x30e   : > { %v3422_v25 = vsel %vm1293_vm11, 1.0, %v4007_v0 }
 0x30f   : > { %2089 = vbcast.lane.b32.xlu0 %v1895_v12, 256  ;;  %vm1295_vm13 = vcmp.ge.f32.partialorder %v1276_v19, %v1241_v30  ;;  %v1325_v34 = vsel %vm386_vm1, %v3422_v25, 0.0  ;;  %v1349_v31 = vmul.f32 %v3422_v25, %v1268_v9  ;;  %v1280_v10 = vrot.slane %v1192_v23, %v4342_v29 }
 0x310   : > { %v4537_v58 = vpop.permute.xlu0 %1418 }
 0x311   : > { %vm1296_vm2 = vcmp.ge.f32.partialorder %v1280_v10, %v4515_v41 }
 0x312   : > { %v4622_v25 = vsel %vm1296_vm2, 1.0, %v4007_v0 }
 0x313   : > { %2096 = vbcast.lane.b32.xlu0 %v1902_v62, 256  ;;  %v1220_v62 = vpop.permute.xlu1 %1219 }
 0x314   : > { %v4543_v59 = vpop.permute.xlu0 %1432 }
 0x317   : > { %2103 = vbcast.lane.b32.xlu0 %v1909_v18, 256  ;;  %v1234_v12 = vpop.permute.xlu1 %1233  ;;  %v1191_v18 = vcombine.high %v4560_v3, %v4560_v3 }
 0x318   : > { %v4549_v61 = vpop.permute.xlu0 %1439 }
 0x319   : > { %v1264_v7 = vrot.slane %v1191_v18, %v4342_v29 }
 0x31b   : > { %2110 = vbcast.lane.b32.xlu0 %v1916_v24, 256  ;;  %v1319_v24 = vsel %vm386_vm1, %v4477_v20, 0.0  ;;  %v4576_v27 = vpop.permute.xlu1 %1397  ;;  %v3424_v20 = vsel %vm1295_vm13, 1.0, %v4007_v0  ;;  %vm1292_vm14 = vcmp.ge.f32.partialorder %v1264_v7, %v1220_v62 }
 0x31c   : > { %2546 = vbcast.lane.b32.xlu1 %v2544_v42, 256  ;;  %v1331_v39 = vsel %vm386_vm1, %v3424_v20, 0.0  ;;  %v4590_v47 = vsel %vm1292_vm14, 1.0, %v4007_v0 }
 0x31f   : > { %v4592_v30 = vpop.permute.xlu1 %1404 }
 0x320   : > { %2553 = vbcast.lane.b32.xlu1 %v4495_v44, 256 }
 0x324   : > { %2560 = vbcast.lane.b32.xlu1 %v4500_v46, 256 }
 0x328   : > { %2574 = vbcast.lane.b32.xlu1 %v4505_v26, 256 }
 0x32c   : > { %2588 = vbcast.lane.b32.xlu1 %v4510_v38, 256 }
 0x330   : > { %2738 = vbcast.lane.b32.xlu1 %v2544_v42, 256  ;;  %v1345_v42 = vmul.f32 %v4583_v36, %v1252_v6 }
 0x334   : > { %2759 = vbcast.lane.b32.xlu1 %v2565_v51, 256 }
 0x338   : > { %2773 = vbcast.lane.b32.xlu1 %v2579_v54, 256 }
 0x33a   : > { %682 = vadd.xlane.f32.xlu0 %v681_v45 }
 0x33e   : > { %688 = vadd.xlane.f32.xlu0 %v687_v35  ;;  %v1353_v35 = vsel %vm386_vm1, %v1345_v42, 0.0  ;;  %v4013_v42 = vmov 0  }
 0x33f   : > { %3675 = vset.pattern.permute.xlu1 %v4013_v42  ;;  %3669 = vset.pattern.permute.xlu0 %v4013_v42 }
 0x342   : > { %694 = vadd.xlane.f32.xlu0 %v693_v22  ;;  %v1348_v22 = vmul.f32 %v4590_v47, %v1264_v7 }
 0x344   : > { %v1362_v62 = vsel %vm386_vm1, %v1348_v22, 0.0 }
 0x346   : > { %700 = vadd.xlane.f32.xlu0 %v699_v37  ;;  %v4599_v37 = vpop.permute.xlu1 %1425 }
 0x34a   : > { %v4608_v1 = vpop.xlane.xlu1 %642 }
 0x34e   : > { %v4624_v7 = vpop.permute.xlu1 %1876 }
 0x352   : > { %v4552_v63 = vpop.xlane.xlu0 %639 }
 0x356   : > { %v4557_v2 = vpop.xlane.xlu0 %645 }
 0x35a   : > { %v4563_v15 = vpop.xlane.xlu0 %648 }
 0x35c   : > { %2539 = vbcast.lane.b32.xlu0 %v2537_v17, 256  ;;  %1320 = vadd.xlane.f32.xlu1 %v1319_v24  ;;  %v1351_v24 = vmul.f32 %v3424_v20, %v1276_v19  ;;  %v1884_v19 = vpop.permute.xlu1 %1883  ;;  %v1815_v20 = vcombine.high %v4430_v48, %v4430_v48 }
 0x35e   : > { %v4578_v28 = vpop.xlane.xlu0 %651  ;;  %v1371_v41 = vsel %vm386_vm1, %v1351_v24, 0.0 }
 0x360   : > { %2567 = vbcast.lane.b32.xlu0 %v2565_v51, 256  ;;  %1326 = vadd.xlane.f32.xlu1 %v1325_v34  ;;  %v1272_v51 = vrot.slane %v1188_v11, %v4342_v29 }
 0x362   : > { %v4594_v45 = vpop.xlane.xlu0 %654  ;;  %vm1294_vm15 = vcmp.ge.f32.partialorder %v1272_v51, %v1234_v12  ;;  %v1822_v12 = vrot.slane %v4430_v48, %v4376_v50 }
 0x364   : > { %2581 = vbcast.lane.b32.xlu0 %v2579_v54, 256  ;;  %1332 = vadd.xlane.f32.xlu1 %v1331_v39  ;;  %v4605_v54 = vsel %vm1294_vm15, 1.0, %v4007_v0  ;;  %v1830_v33 = vcombine.high %v1822_v12, %v1822_v12  ;;  %v1352_v39 = vmul.f32 %v4622_v25, %v1280_v10  ;;  %v1891_v10 = vpop.permute.xlu1 %1890 }
 0x365   : > { %v1350_v6 = vmul.f32 %v4605_v54, %v1272_v51 }
 0x366   : > { %v4601_v14 = vpop.xlane.xlu0 %657 }
 0x367   : > { %v1368_v9 = vsel %vm386_vm1, %v1350_v6, 0.0 }
 0x368   : > { %2731 = vbcast.lane.b32.xlu0 %v2537_v17, 256  ;;  %1354 = vadd.xlane.f32.xlu1 %v1353_v35  ;;  %v1365_v17 = vsel %vm386_vm1, %v1349_v31, 0.0  ;;  %v1374_v35 = vsel %vm386_vm1, %v1352_v39, 0.0 }
 0x36a   : > { %v4615_v18 = vpop.xlane.xlu0 %660 }
 0x36c   : > { %2745 = vbcast.lane.b32.xlu0 %v4495_v44, 256  ;;  %1363 = vadd.xlane.f32.xlu1 %v1362_v62  ;;  %v1838_v44 = vrot.slane %v1822_v12, %v4376_v50 }
 0x36e   : > { %v1870_v34 = vpop.permute.xlu0 %1869  ;;  %v1860_v11 = vcombine.high %v1838_v44, %v1838_v44 }
 0x370   : > { %2752 = vbcast.lane.b32.xlu0 %v4500_v46, 256  ;;  %1366 = vadd.xlane.f32.xlu1 %v1365_v17  ;;  %v1923_v46 = vrot.slane %v1838_v44, %v4342_v29  ;;  %v1931_v51 = vrot.slane %v1860_v11, %v4342_v29 }
 0x372   : > { %vm1960_vm3 = vcmp.ge.f32.partialorder %v1923_v46, %v1870_v34  ;;  %vm1962_vm4 = vcmp.ge.f32.partialorder %v1931_v51, %v1884_v19  ;;  %v1898_v24 = vpop.permute.xlu0 %1897  ;;  %v1905_v19 = vpop.permute.xlu1 %1904 }
 0x373   : > { %v3439_v22 = vsel %vm1960_vm3, 1.0, %v4007_v0  ;;  %v3441_v31 = vsel %vm1962_vm4, 1.0, %v4007_v0 }
 0x374   : > { %2766 = vbcast.lane.b32.xlu0 %v4505_v26, 256  ;;  %1369 = vadd.xlane.f32.xlu1 %v1368_v9  ;;  %v4634_v26 = vrot.slane %v1830_v33, %v4376_v50  ;;  %v1984_v62 = vsel %vm386_vm1, %v3439_v22, 0.0  ;;  %v1990_v44 = vsel %vm386_vm1, %v3441_v31, 0.0  ;;  %v2016_v9 = vmul.f32 %v3439_v22, %v1923_v46 }
 0x376   : > { %v1862_v23 = vcombine.high %v4634_v26, %v4634_v26  ;;  %v2024_v11 = vsel %vm386_vm1, %v2016_v9, 0.0 }
 0x378   : > { %2780 = vbcast.lane.b32.xlu0 %v4510_v38, 256  ;;  %1372 = vadd.xlane.f32.xlu1 %v1371_v41  ;;  %v1829_v38 = vrot.slane %v1815_v20, %v4376_v50  ;;  %v1935_v17 = vrot.slane %v1862_v23, %v4342_v29  ;;  %v2018_v41 = vmul.f32 %v3441_v31, %v1931_v51 }
 0x37a   : > { %v1831_v12 = vcombine.high %v1829_v38, %v1829_v38  ;;  %v1845_v6 = vrot.slane %v1829_v38, %v4376_v50  ;;  %vm1963_vm5 = vcmp.ge.f32.partialorder %v1935_v17, %v1891_v10  ;;  %v2030_v46 = vsel %vm386_vm1, %v2018_v41, 0.0  ;;  %v1912_v38 = vpop.permute.xlu0 %1911 }
 0x37b   : > { %v4651_v39 = vsel %vm1963_vm5, 1.0, %v4007_v0 }
 0x37c   : > { %1375 = vadd.xlane.f32.xlu1 %v1374_v35  ;;  %v1859_v33 = vrot.slane %v1831_v12, %v4376_v50  ;;  %v1939_v34 = vrot.slane %v1845_v6, %v4342_v29  ;;  %v1861_v42 = vcombine.high %v1845_v6, %v1845_v6  ;;  %v2019_v35 = vmul.f32 %v4651_v39, %v1935_v17 }
 0x37d   : > { %v1256_v12 = vrot.slane %v4560_v3, %v4342_v29 }
 0x37e   : > { %vm1964_vm6 = vcmp.ge.f32.partialorder %v1939_v34, %v1898_v24  ;;  %v1943_v20 = vrot.slane %v1859_v33, %v4342_v29  ;;  %v1947_v51 = vrot.slane %v1861_v42, %v4342_v29  ;;  %v1863_v23 = vcombine.high %v1859_v33, %v1859_v33  ;;  %v1919_v6 = vpop.permute.xlu0 %1918 }
 0x37f   : > { %v3443_v22 = vsel %vm1964_vm6, 1.0, %v4007_v0  ;;  %vm1290_vm9 = vcmp.ge.f32.partialorder %v1256_v12, %v4547_v60  ;;  %v1313_v33 = vsel %vm386_vm1, %v4583_v36, 0.0  ;;  %v1322_v42 = vsel %vm386_vm1, %v4590_v47, 0.0 }
 0x380   : > { %1985 = vadd.xlane.f32.xlu1 %v1984_v62  ;;  %vm1965_vm7 = vcmp.ge.f32.partialorder %v1943_v20, %v1905_v19  ;;  %v2033_v62 = vsel %vm386_vm1, %v2019_v35, 0.0  ;;  %v2020_v31 = vmul.f32 %v3443_v22, %v1939_v34  ;;  %vm1966_vm8 = vcmp.ge.f32.partialorder %v1947_v51, %v1912_v38  ;;  %v4680_v38 = vpop.permute.xlu1 %2068 }
 0x381   : > { %v3444_v10 = vsel %vm1965_vm7, 1.0, %v4007_v0  ;;  %v1951_v17 = vrot.slane %v1863_v23, %v4342_v29  ;;  %v3445_v24 = vsel %vm1966_vm8, 1.0, %v4007_v0  ;;  %v3419_v3 = vsel %vm1290_vm9, 1.0, %v4007_v0 }
 0x382   : > { %v2021_v9 = vmul.f32 %v3444_v10, %v1943_v20  ;;  %v1316_v19 = vsel %vm386_vm1, %v3419_v3, 0.0  ;;  %v4675_v36 = vpop.permute.xlu0 %2061  ;;  %v1328_v35 = vsel %vm386_vm1, %v4605_v54, 0.0  ;;  %v1334_v23 = vsel %vm386_vm1, %v4622_v25, 0.0 }
 0x383   : > { %vm1967_vm10 = vcmp.ge.f32.partialorder %v1951_v17, %v1919_v6  ;;  %v1359_v54 = vsel %vm386_vm1, %v4480_v21, 0.0  ;;  %v2492_v21 = vrot.slane %v4489_v40, %v4376_v50 }
 0x384   : > { %1991 = vadd.xlane.f32.xlu1 %v1990_v44  ;;  %v2036_v44 = vsel %vm386_vm1, %v2020_v31, 0.0  ;;  %v2039_v34 = vsel %vm386_vm1, %v2021_v9, 0.0  ;;  %v3446_v41 = vsel %vm1967_vm10, 1.0, %v4007_v0  ;;  %v1927_v31 = vrot.slane %v4634_v26, %v4342_v29 }
 0x385   : > { %v2023_v20 = vmul.f32 %v3446_v41, %v1951_v17 }
 0x386   : > { %vm1961_vm11 = vcmp.ge.f32.partialorder %v1927_v31, %v4624_v7  ;;  %v1996_v7 = vsel %vm386_vm1, %v3443_v22, 0.0 }
 0x387   : > { %v3440_v25 = vsel %vm1961_vm11, 1.0, %v4007_v0 }
 0x388   : > { %2025 = vadd.xlane.f32.xlu1 %v2024_v11  ;;  %v2022_v11 = vmul.f32 %v3445_v24, %v1947_v51  ;;  %v4682_v51 = vpop.permute.xlu0 %2075  ;;  %v1987_v9 = vsel %vm386_vm1, %v3440_v25, 0.0 }
 0x38a   : > { %v2042_v60 = vsel %vm386_vm1, %v2022_v11, 0.0 }
 0x38c   : > { %2031 = vadd.xlane.f32.xlu1 %v2030_v46  ;;  %v2045_v46 = vsel %vm386_vm1, %v2023_v20, 0.0  ;;  %v4686_v47 = vpop.xlane.xlu1 %679  ;;  %v4691_v17 = vpop.permute.xlu0 %2082 }
 0x390   : > { %2034 = vadd.xlane.f32.xlu1 %v2033_v62  ;;  %v1346_v62 = vmul.f32 %v3419_v3, %v1256_v12  ;;  %v4699_v12 = vpop.permute.xlu0 %2089 }
 0x392   : > { %v1356_v6 = vsel %vm386_vm1, %v1346_v62, 0.0  ;;  %v2005_v62 = vsel %vm386_vm1, %v3446_v41, 0.0 }
 0x394   : > { %2037 = vadd.xlane.f32.xlu1 %v2036_v44  ;;  %v4696_v44 = vpop.xlane.xlu1 %685 }
 0x397   : > { %1314 = vadd.xlane.f32.xlu0 %v1313_v33  ;;  %v1993_v33 = vsel %vm386_vm1, %v4651_v39, 0.0 }
 0x398   : > { %2040 = vadd.xlane.f32.xlu1 %v2039_v34  ;;  %v4702_v26 = vpop.xlane.xlu1 %691  ;;  %v4706_v34 = vpop.permute.xlu0 %2096 }
 0x39b   : > { %1317 = vadd.xlane.f32.xlu0 %v1316_v19  ;;  %v2500_v19 = vcombine.high %v2492_v21, %v2492_v21 }
 0x39c   : > { %2043 = vadd.xlane.f32.xlu1 %v2042_v60  ;;  %v4711_v3 = vpop.xlane.xlu1 %697  ;;  %v4713_v11 = vpop.permute.xlu0 %2103  ;;  %v1999_v60 = vsel %vm386_vm1, %v3444_v10, 0.0 }
 0x39d   : > { %5239 = vst [vmem:[#allocation29_spill] sm:$0xff] %v4713_v11  ;;  %v2522_v39 = vrot.slane %v2500_v19, %v4376_v50 }
 0x39f   : > { %1323 = vadd.xlane.f32.xlu0 %v1322_v42  ;;  %v2508_v42 = vrot.slane %v2492_v21, %v4376_v50  ;;  %v4722_v22 = vrot.slane %v2522_v39, %v4342_v29 }
 0x3a0   : > { %2046 = vadd.xlane.f32.xlu1 %v2045_v46  ;;  %v2547_v20 = vpop.permute.xlu1 %2546  ;;  %v2002_v46 = vsel %vm386_vm1, %v3445_v24, 0.0  ;;  %v2485_v24 = vcombine.high %v4489_v40, %v4489_v40 }
 0x3a1   : > { %vm2631_vm12 = vcmp.ge.f32.partialorder %v4722_v22, %v2547_v20 }
 0x3a2   : > { %v3461_v41 = vsel %vm2631_vm12, 1.0, %v4007_v0  ;;  %v2499_v19 = vrot.slane %v2485_v24, %v4376_v50 }
 0x3a3   : > { %1329 = vadd.xlane.f32.xlu0 %v1328_v35  ;;  %v4719_v35 = vpop.permute.xlu0 %2110 }
 0x3a4   : > { %5240 = vst [vmem:[#allocation30_spill] sm:$0xff] %v4719_v35 }
 0x3a7   : > { %1335 = vadd.xlane.f32.xlu0 %v1334_v23  ;;  %v2530_v23 = vcombine.high %v2508_v42, %v2508_v42 }
 0x3ab   : > { %1357 = vadd.xlane.f32.xlu0 %v1356_v6  ;;  %v2017_v6 = vmul.f32 %v3440_v25, %v1927_v31 }
 0x3ad   : > { %v2027_v21 = vsel %vm386_vm1, %v2017_v6, 0.0 }
 0x3af   : > { %1360 = vadd.xlane.f32.xlu0 %v1359_v54  ;;  %v2554_v54 = vpop.permute.xlu1 %2553 }
 0x3b3   : > { %1988 = vadd.xlane.f32.xlu0 %v1987_v9  ;;  %v2601_v9 = vrot.slane %v2530_v23, %v4342_v29  ;;  %v2561_v31 = vpop.permute.xlu1 %2560 }
 0x3b5   : > { %vm2632_vm13 = vcmp.ge.f32.partialorder %v2601_v9, %v2554_v54  ;;  %v2515_v54 = vrot.slane %v2499_v19, %v4376_v50 }
 0x3b7   : > { %1994 = vadd.xlane.f32.xlu0 %v1993_v33  ;;  %v2532_v33 = vcombine.high %v2522_v39, %v2522_v39  ;;  %v3462_v39 = vsel %vm2632_vm13, 1.0, %v4007_v0  ;;  %v2531_v48 = vcombine.high %v2515_v54, %v2515_v54 }
 0x3b8   : > { %v2660_v23 = vsel %vm386_vm1, %v3462_v39, 0.0  ;;  %v2688_v11 = vmul.f32 %v3462_v39, %v2601_v9  ;;  %v2687_v39 = vmul.f32 %v3461_v41, %v4722_v22 }
 0x3b9   : > { %v4736_v25 = vrot.slane %v2532_v33, %v4342_v29 }
 0x3bb   : > { %1997 = vadd.xlane.f32.xlu0 %v1996_v7  ;;  %vm2633_vm14 = vcmp.ge.f32.partialorder %v4736_v25, %v2561_v31 }
 0x3bc   : > { %v3463_v6 = vsel %vm2633_vm14, 1.0, %v4007_v0 }
 0x3bd   : > { %v2663_v24 = vsel %vm386_vm1, %v3463_v6, 0.0 }
 0x3bf   : > { %2000 = vadd.xlane.f32.xlu0 %v1999_v60  ;;  %v2657_v60 = vsel %vm386_vm1, %v3461_v41, 0.0 }
 0x3c3   : > { %2003 = vadd.xlane.f32.xlu0 %v2002_v46  ;;  %v2501_v46 = vcombine.high %v2499_v19, %v2499_v19 }
 0x3c5   : > { %v2529_v33 = vrot.slane %v2501_v46, %v4376_v50 }
 0x3c7   : > { %2006 = vadd.xlane.f32.xlu0 %v2005_v62  ;;  %v4725_v10 = vpop.xlane.xlu0 %682  ;;  %v2613_v53 = vrot.slane %v2529_v33, %v4342_v29  ;;  %v2533_v32 = vcombine.high %v2529_v33, %v2529_v33 }
 0x3cb   : > { %2028 = vadd.xlane.f32.xlu0 %v2027_v21  ;;  %v4732_v7 = vpop.xlane.xlu0 %688  ;;  %v2593_v21 = vrot.slane %v2508_v42, %v4342_v29 }
 0x3cf   : > { %2658 = vadd.xlane.f32.xlu0 %v2657_v60  ;;  %v4740_v20 = vpop.xlane.xlu0 %694  ;;  %v2575_v60 = vpop.permute.xlu1 %2574 }
 0x3d0   : > { %vm2635_vm2 = vcmp.ge.f32.partialorder %v2613_v53, %v2575_v60  ;;  %v2700_v60 = vsel %vm386_vm1, %v2688_v11, 0.0 }
 0x3d3   : > { %2661 = vadd.xlane.f32.xlu0 %v2660_v23  ;;  %v4745_v62 = vpop.xlane.xlu0 %700  ;;  %v2609_v23 = vrot.slane %v2515_v54, %v4342_v29  ;;  %v2589_v42 = vpop.permute.xlu1 %2588 }
 0x3d7   : > { %2664 = vadd.xlane.f32.xlu0 %v2663_v24  ;;  %v2540_v40 = vpop.permute.xlu0 %2539  ;;  %v2621_v24 = vrot.slane %v2533_v32, %v4342_v29 }
 0x3d8   : > { %vm2630_vm15 = vcmp.ge.f32.partialorder %v2593_v21, %v2540_v40  ;;  %v2617_v40 = vrot.slane %v2531_v48, %v4342_v29 }
 0x3d9   : > { %v3460_v31 = vsel %vm2630_vm15, 1.0, %v4007_v0  ;;  %vm2637_vm4 = vcmp.ge.f32.partialorder %v2621_v24, %v2589_v42  ;;  %v2697_v42 = vsel %vm386_vm1, %v2687_v39, 0.0 }
 0x3da   : > { %v2654_v19 = vsel %vm386_vm1, %v3460_v31, 0.0  ;;  %v2686_v16 = vmul.f32 %v3460_v31, %v2593_v21  ;;  %v3465_v21 = vsel %vm2635_vm2, 1.0, %v4007_v0  ;;  %v3467_v48 = vsel %vm2637_vm4, 1.0, %v4007_v0 }
 0x3db   : > { %2655 = vadd.xlane.f32.xlu1 %v2654_v19  ;;  %v2568_v50 = vpop.permute.xlu0 %2567  ;;  %v2669_v31 = vsel %vm386_vm1, %v3465_v21, 0.0  ;;  %v2691_v19 = vmul.f32 %v3465_v21, %v2613_v53  ;;  %v2675_v11 = vsel %vm386_vm1, %v3467_v48, 0.0  ;;  %v777_v53 = vmul.f32 %v4527_v55, %v4563_v15 }
 0x3dc   : > { %vm2634_vm3 = vcmp.ge.f32.partialorder %v2609_v23, %v2568_v50  ;;  %v2694_v35 = vsel %vm386_vm1, %v2686_v16, 0.0  ;;  %v4773_v50 = vpop.permute.xlu1 %2738  ;;  %v779_v21 = vmul.f32 %v4535_v57, %v4594_v45  ;;  %v778_v15 = vmul.f32 %v4453_v5, %v4578_v28 }
 0x3dd   : > { %v3464_v46 = vsel %vm2634_vm3, 1.0, %v4007_v0  ;;  %v2709_v29 = vsel %vm386_vm1, %v2691_v19, 0.0 }
 0x3de   : > { %v2666_v54 = vsel %vm386_vm1, %v3464_v46, 0.0  ;;  %v2690_v41 = vmul.f32 %v3464_v46, %v2609_v23  ;;  %v786_v46 = vadd.f32 1.0, %v778_v15  ;;  %v4830_v15 = vld [vmem:[%s335_s5] sm:$0xff] }
 0x3df   : > { %2695 = vadd.xlane.f32.xlu1 %v2694_v35  ;;  %2667 = vadd.xlane.f32.xlu0 %v2666_v54  ;;  %v2582_v33 = vpop.permute.xlu0 %2581  ;;  %v2693_v35 = vmul.f32 %v3467_v48, %v2621_v24  ;;  %v2689_v54 = vmul.f32 %v3463_v6, %v4736_v25  ;;  %v776_v24 = vmul.f32 %v4519_v43, %v4557_v2  ;;  %v787_v2 = vadd.f32 1.0, %v779_v21 }
 0x3e0   : > { %vm2636_vm5 = vcmp.ge.f32.partialorder %v2617_v40, %v2582_v33  ;;  %v785_v33 = vadd.f32 1.0, %v777_v53  ;;  %v774_v25 = vmul.f32 %v4513_v49, %v4552_v63  ;;  %v2706_v45 = vsel %vm386_vm1, %v2690_v41, 0.0  ;;  %3516 = vmatpush3.msra.mxu0 %v4830_v15 }
 0x3e1   : > { %v3466_v16 = vsel %vm2636_vm5, 1.0, %v4007_v0  ;;  %v2715_v9 = vsel %vm386_vm1, %v2693_v35, 0.0  ;;  %v2703_v22 = vsel %vm386_vm1, %v2689_v54, 0.0  ;;  %vm795_vm8 = vcmp.gt.f32.partialorder %v787_v2, %v4740_v20  ;;  %3525 = vmatprep.subr.mxu0 %v4007_v0 }
 0x3e2   : > { %v2672_v32 = vsel %vm386_vm1, %v3466_v16, 0.0  ;;  %vm793_vm6 = vcmp.gt.f32.partialorder %v785_v33, %v4732_v7  ;;  %v2692_v6 = vmul.f32 %v3466_v16, %v2617_v40  ;;  %v782_v28 = vadd.f32 1.0, %v774_v25 }
 0x3e3   : > { %2701 = vadd.xlane.f32.xlu1 %v2700_v60  ;;  %2670 = vadd.xlane.f32.xlu0 %v2669_v31  ;;  %v784_v60 = vadd.f32 1.0, %v776_v24  ;;  %v4784_v31 = vpop.permute.xlu1 %2759  ;;  %v3409_v23 = vsel %vm793_vm6, 1.0, %v4007_v0  ;;  %v781_v7 = vmul.f32 %v4541_v13, %v4615_v18  ;;  %vm794_vm9 = vcmp.gt.f32.partialorder %v786_v46, %v4702_v26  ;;  %v4810_v53 = vpop.permute.xlu0 %2731 }
 0x3e4   : > { %v2712_v48 = vsel %vm386_vm1, %v2692_v6, 0.0  ;;  %v3411_v40 = vsel %vm795_vm8, 1.0, %v4007_v0  ;;  %vm790_vm10 = vcmp.gt.f32.partialorder %v782_v28, %v4686_v47  ;;  %v3410_v20 = vsel %vm794_vm9, 1.0, %v4007_v0 }
 0x3e5   : > { %vm792_vm7 = vcmp.gt.f32.partialorder %v784_v60, %v4696_v44  ;;  %v789_v16 = vadd.f32 1.0, %v781_v7  ;;  %v3406_v18 = vsel %vm790_vm10, 1.0, %v4007_v0  ;;  %v775_v35 = vmul.f32 %v4451_v4, %v4608_v1 }
 0x3e6   : > { %v3408_v19 = vsel %vm792_vm7, 1.0, %v4007_v0  ;;  %v898_v26 = vmul.f32 %v3406_v18, %v4513_v49  ;;  %v901_v25 = vmul.f32 %v3409_v23, %v4527_v55 }
 0x3e7   : > { %2710 = vadd.xlane.f32.xlu1 %v2709_v29  ;;  %2673 = vadd.xlane.f32.xlu0 %v2672_v32  ;;  %v4797_v63 = vpop.permute.xlu1 %2773  ;;  %v3676_v44 = vpack.i.bf16 %v3409_v23, %v3408_v19  ;;  %v3681_v29 = vpack.i.bf16 %v3411_v40, %v3410_v20  ;;  %vm797_vm11 = vcmp.gt.f32.partialorder %v789_v16, %v4745_v62  ;;  %v783_v39 = vadd.f32 1.0, %v775_v35  ;;  %v4818_v54 = vpop.permute.xlu0 %2745 }
 0x3e8   : > { %v900_v60 = vmul.f32 %v3408_v19, %v4519_v43  ;;  %v903_v43 = vmul.f32 %v3411_v40, %v4535_v57 }
 0x3e9   : > { %vm791_vm12 = vcmp.gt.f32.partialorder %v783_v39, %v4725_v10 }
 0x3ea   : > { %v3407_v49 = vsel %vm791_vm12, 1.0, %v4007_v0 }
 0x3eb   : > { %2716 = vadd.xlane.f32.xlu1 %v2715_v9  ;;  %2676 = vadd.xlane.f32.xlu0 %v2675_v11  ;;  %v1321_v32 = vpop.xlane.xlu1 %1320  ;;  %v3413_v9 = vsel %vm797_vm11, 1.0, %v4007_v0  ;;  %v899_v10 = vmul.f32 %v3407_v49, %v4451_v4 }
 0x3ec   : > { %v905_v47 = vmul.f32 %v3413_v9, %v4541_v13  ;;  %v3670_v13 = vpack.i.bf16 %v3407_v49, %v3406_v18 }
 0x3ef   : > { %2698 = vadd.xlane.f32.xlu0 %v2697_v42  ;;  %v1327_v11 = vpop.xlane.xlu1 %1326  ;;  %v780_v42 = vmul.f32 %v4463_v8, %v4601_v14 }
 0x3f1   : > { %v788_v1 = vadd.f32 1.0, %v780_v42 }
 0x3f3   : > { %2704 = vadd.xlane.f32.xlu0 %v2703_v22  ;;  %v4815_v62 = vpop.xlane.xlu1 %1332  ;;  %vm796_vm13 = vcmp.gt.f32.partialorder %v788_v1, %v4711_v3  ;;  %v4822_v22 = vpop.permute.xlu0 %2752 }
 0x3f4   : > { %v3412_v33 = vsel %vm796_vm13, 1.0, %v4007_v0 }
 0x3f5   : > { %v3686_v21 = vpack.i.bf16 %v3413_v9, %v3412_v33  ;;  %v904_v19 = vmul.f32 %v3412_v33, %v4463_v8  ;;  %v1451_v8 = vmul.f32 %v4592_v30, %v1321_v32 }
 0x3f7   : > { %2707 = vadd.xlane.f32.xlu0 %v2706_v45  ;;  %v1355_v24 = vpop.xlane.xlu1 %1354  ;;  %v4825_v41 = vpop.permute.xlu0 %2766  ;;  %v902_v45 = vmul.f32 %v3410_v20, %v4453_v5  ;;  %v1459_v1 = vadd.f32 1.0, %v1451_v8 }
 0x3fb   : > { %2713 = vadd.xlane.f32.xlu0 %v2712_v48  ;;  %v1364_v14 = vpop.xlane.xlu1 %1363  ;;  %v4835_v2 = vpop.permute.xlu0 %2780 }
 0x3fc   : > { %3677 = vperm.xlu1 %3675, %v3676_v44  }
 0x3ff   : > { %v1367_v3 = vpop.xlane.xlu1 %1366 }
 0x400   : > { %3682 = vperm.xlu1 %3675, %v3681_v29   ;;  %v1453_v29 = vmul.f32 %v4537_v58, %v1327_v11 }
 0x403   : > { %v1370_v4 = vpop.xlane.xlu1 %1369 }
 0x404   : > { %915 = vperm.xlu1 %3675, %v898_v26  }
 0x407   : > { %v4839_v46 = vpop.xlane.xlu1 %1372 }
 0x408   : > { %936 = vperm.xlu1 %3675, %v905_v47   ;;  %v1461_v47 = vadd.f32 1.0, %v1453_v29 }
 0x40a   : > { %vm1469_vm3 = vcmp.gt.f32.partialorder %v1461_v47, %v1367_v3 }
 0x40b   : > { %v4842_v44 = vpop.xlane.xlu1 %1375  ;;  %v3430_v32 = vsel %vm1469_vm3, 1.0, %v4007_v0 }
 0x40f   : > { %v1986_v40 = vpop.xlane.xlu1 %1985 }
 0x410   : > { %v2120_v29 = vmul.f32 %v4675_v36, %v1986_v40 }
 0x411   : > { %3671 = vperm.xlu0 %3669, %v3670_v13  }
 0x412   : > { %v2128_v47 = vadd.f32 1.0, %v2120_v29 }
 0x413   : > { %v1992_v39 = vpop.xlane.xlu1 %1991 }
 0x415   : > { %3687 = vperm.xlu0 %3669, %v3686_v21  }
 0x419   : > { %918 = vperm.xlu0 %3669, %v899_v10  }
 0x41d   : > { %921 = vperm.xlu0 %3669, %v900_v60  }
 0x421   : > { %924 = vperm.xlu0 %3669, %v901_v25   ;;  %v2026_v25 = vpop.xlane.xlu1 %2025 }
 0x422   : > { %vm2136_vm10 = vcmp.gt.f32.partialorder %v2128_v47, %v2026_v25 }
 0x424   : > { %v1315_v6 = vpop.xlane.xlu0 %1314 }
 0x425   : > { %927 = vperm.xlu0 %3669, %v902_v45   ;;  %v1449_v55 = vmul.f32 %v4521_v52, %v1315_v6 }
 0x427   : > { %v1457_v5 = vadd.f32 1.0, %v1449_v55 }
 0x428   : > { %v1318_v28 = vpop.xlane.xlu0 %1317 }
 0x429   : > { %930 = vperm.xlu0 %3669, %v903_v43   ;;  %v1450_v20 = vmul.f32 %v4576_v27, %v1318_v28  ;;  %vm1465_vm14 = vcmp.gt.f32.partialorder %v1457_v5, %v1355_v24  ;;  %v2032_v28 = vpop.xlane.xlu1 %2031 }
 0x42a   : > { %v3426_v42 = vsel %vm1465_vm14, 1.0, %v4007_v0 }
 0x42b   : > { %v1458_v26 = vadd.f32 1.0, %v1450_v20  ;;  %v1564_v3 = vmul.f32 %v3426_v42, %v4521_v52  ;;  %v1568_v52 = vmul.f32 %v3430_v32, %v4537_v58 }
 0x42c   : > { %v1324_v7 = vpop.xlane.xlu0 %1323 }
 0x42d   : > { %933 = vperm.xlu0 %3669, %v904_v19   ;;  %v1452_v57 = vmul.f32 %v4529_v56, %v1324_v7  ;;  %v2035_v20 = vpop.xlane.xlu1 %2034 }
 0x42f   : > { %v1460_v35 = vadd.f32 1.0, %v1452_v57 }
 0x430   : > { %v1330_v23 = vpop.xlane.xlu0 %1329 }
 0x431   : > { %v1454_v48 = vmul.f32 %v4599_v37, %v1330_v23  ;;  %vm1468_vm4 = vcmp.gt.f32.partialorder %v1460_v35, %v1364_v14  ;;  %v1455_v14 = vmul.f32 %v4543_v59, %v4815_v62  ;;  %v2038_v8 = vpop.xlane.xlu1 %2037 }
 0x432   : > { %v3429_v24 = vsel %vm1468_vm4, 1.0, %v4007_v0 }
 0x433   : > { %v1462_v18 = vadd.f32 1.0, %v1454_v48  ;;  %v1463_v19 = vadd.f32 1.0, %v1455_v14  ;;  %v1567_v7 = vmul.f32 %v3429_v24, %v4529_v56 }
 0x434   : > { %v1336_v16 = vpop.xlane.xlu0 %1335 }
 0x435   : > { %vm1470_vm15 = vcmp.gt.f32.partialorder %v1462_v18, %v1370_v4  ;;  %v1456_v43 = vmul.f32 %v4549_v61, %v1336_v16  ;;  %vm1471_vm6 = vcmp.gt.f32.partialorder %v1463_v19, %v4839_v46 }
 0x436   : > { %v3431_v11 = vsel %vm1470_vm15, 1.0, %v4007_v0  ;;  %v3432_v5 = vsel %vm1471_vm6, 1.0, %v4007_v0 }
 0x437   : > { %v3701_v10 = vpack.i.bf16 %v3431_v11, %v3430_v32  ;;  %v1464_v48 = vadd.f32 1.0, %v1456_v43  ;;  %v1569_v62 = vmul.f32 %v3431_v11, %v4599_v37 }
 0x438   : > { %v1358_v9 = vpop.xlane.xlu0 %1357 }
 0x439   : > { %vm1466_vm2 = vcmp.gt.f32.partialorder %v1458_v26, %v1358_v9  ;;  %vm1472_vm7 = vcmp.gt.f32.partialorder %v1464_v48, %v4842_v44 }
 0x43a   : > { %v3427_v49 = vsel %vm1466_vm2, 1.0, %v4007_v0  ;;  %v3433_v16 = vsel %vm1472_vm7, 1.0, %v4007_v0 }
 0x43b   : > { %v3691_v13 = vpack.i.bf16 %v3427_v49, %v3426_v42  ;;  %v1565_v45 = vmul.f32 %v3427_v49, %v4576_v27  ;;  %v2122_v27 = vmul.f32 %v4682_v51, %v1992_v39  ;;  %v1571_v44 = vmul.f32 %v3433_v16, %v4549_v61 }
 0x43c   : > { %v1361_v33 = vpop.xlane.xlu0 %1360  ;;  %v3447_v61 = vsel %vm2136_vm10, 1.0, %v4007_v0  ;;  %vm880_vm10 = vcmask 1041409  }
 0x43d   : > { %vm1467_vm5 = vcmp.gt.f32.partialorder %v1459_v1, %v1361_v33  ;;  %3692 = vperm.xlu1 %3675, %v3691_v13   ;;  %v2130_v46 = vadd.f32 1.0, %v2122_v27  ;;  %v2041_v1 = vpop.xlane.xlu1 %2040  ;;  %v2235_v14 = vmul.f32 %v3447_v61, %v4675_v36 }
 0x43e   : > { %v3428_v21 = vsel %vm1467_vm5, 1.0, %v4007_v0 }
 0x43f   : > { %v3696_v60 = vpack.i.bf16 %v3429_v24, %v3428_v21  ;;  %v1566_v55 = vmul.f32 %v3428_v21, %v4592_v30  ;;  %v1570_v30 = vmul.f32 %v3432_v5, %v4543_v59  ;;  %vm2138_vm8 = vcmp.gt.f32.partialorder %v2130_v46, %v2032_v28 }
 0x440   : > { %v1989_v4 = vpop.xlane.xlu0 %1988  ;;  %v3449_v59 = vsel %vm2138_vm8, 1.0, %v4007_v0 }
 0x441   : > { %3702 = vperm.xlu1 %3675, %v3701_v10   ;;  %3697 = vperm.xlu0 %3669, %v3696_v60   ;;  %v2121_v26 = vmul.f32 %v4680_v38, %v1989_v4  ;;  %v3711_v40 = vpack.i.bf16 %v3449_v59, %v3432_v5  ;;  %v5241_v60 = vld [vmem:[#allocation29_spill] sm:$0xff]  ;;  %v2044_v28 = vpop.xlane.xlu1 %2043 }
 0x443   : > { %v2129_v42 = vadd.f32 1.0, %v2121_v26 }
 0x444   : > { %v1995_v6 = vpop.xlane.xlu0 %1994 }
 0x445   : > { %1581 = vperm.xlu1 %3675, %v1564_v3   ;;  %1584 = vperm.xlu0 %3669, %v1565_v45   ;;  %v2123_v56 = vmul.f32 %v4691_v17, %v1995_v6  ;;  %v5242_v6 = vld [vmem:[#allocation30_spill] sm:$0xff] }
 0x447   : > { %v2131_v37 = vadd.f32 1.0, %v2123_v56 }
 0x448   : > { %v1998_v23 = vpop.xlane.xlu0 %1997 }
 0x449   : > { %1590 = vperm.xlu0 %3669, %v1567_v7   ;;  %1587 = vperm.xlu1 %3675, %v1566_v55   ;;  %v2124_v35 = vmul.f32 %v4699_v12, %v1998_v23  ;;  %vm2139_vm9 = vcmp.gt.f32.partialorder %v2131_v37, %v2035_v20  ;;  %v2237_v7 = vmul.f32 %v3449_v59, %v4682_v51 }
 0x44a   : > { %v3450_v13 = vsel %vm2139_vm9, 1.0, %v4007_v0 }
 0x44b   : > { %v2132_v49 = vadd.f32 1.0, %v2124_v35  ;;  %v3716_v32 = vpack.i.bf16 %v3450_v13, %v3433_v16  ;;  %v2238_v48 = vmul.f32 %v3450_v13, %v4691_v17 }
 0x44c   : > { %v2001_v57 = vpop.xlane.xlu0 %2000 }
 0x44d   : > { %1593 = vperm.xlu0 %3669, %v1568_v52   ;;  %1596 = vperm.xlu1 %3675, %v1569_v62   ;;  %v2125_v18 = vmul.f32 %v4706_v34, %v2001_v57  ;;  %vm2140_vm13 = vcmp.gt.f32.partialorder %v2132_v49, %v2038_v8  ;;  %v2047_v52 = vpop.xlane.xlu1 %2046 }
 0x44e   : > { %v3451_v4 = vsel %vm2140_vm13, 1.0, %v4007_v0  ;;  %vm886_vm13 = vcmask 1044484  }
 0x44f   : > { %v2133_v39 = vadd.f32 1.0, %v2125_v18  ;;  %v2239_v36 = vmul.f32 %v3451_v4, %v4699_v12 }
 0x450   : > { %v2004_v58 = vpop.xlane.xlu0 %2003 }
 0x451   : > { %1599 = vperm.xlu1 %3675, %v1570_v30   ;;  %vm2141_vm11 = vcmp.gt.f32.partialorder %v2133_v39, %v2041_v1  ;;  %v2126_v25 = vmul.f32 %v5241_v60, %v2004_v58 }
 0x452   : > { %v3452_v21 = vsel %vm2141_vm11, 1.0, %v4007_v0  ;;  %vm882_vm11 = vcmask 1042434  }
 0x453   : > { %v3721_v3 = vpack.i.bf16 %v3452_v21, %v3451_v4  ;;  %v2134_v45 = vadd.f32 1.0, %v2126_v25  ;;  %v2240_v5 = vmul.f32 %v3452_v21, %v4706_v34 }
 0x454   : > { %v2007_v9 = vpop.xlane.xlu0 %2006 }
 0x455   : > { %1602 = vperm.xlu1 %3675, %v1571_v44   ;;  %v2127_v43 = vmul.f32 %v5242_v6, %v2007_v9  ;;  %vm2142_vm14 = vcmp.gt.f32.partialorder %v2134_v45, %v2044_v28 }
 0x456   : > { %v3453_v27 = vsel %vm2142_vm14, 1.0, %v4007_v0  ;;  %vm888_vm14 = vcmask 1045509  }
 0x457   : > { %v2135_v23 = vadd.f32 1.0, %v2127_v43  ;;  %v2241_v51 = vmul.f32 %v3453_v27, %v5241_v60 }
 0x458   : > { %v2029_v11 = vpop.xlane.xlu0 %2028 }
 0x459   : > { %vm2137_vm12 = vcmp.gt.f32.partialorder %v2129_v42, %v2029_v11  ;;  %3712 = vperm.xlu1 %3675, %v3711_v40   ;;  %vm2143_vm15 = vcmp.gt.f32.partialorder %v2135_v23, %v2047_v52 }
 0x45a   : > { %v3448_v33 = vsel %vm2137_vm12, 1.0, %v4007_v0  ;;  %vm884_vm12 = vcmask 1043459  }
 0x45b   : > { %v3706_v24 = vpack.i.bf16 %v3448_v33, %v3447_v61  ;;  %v2236_v55 = vmul.f32 %v3448_v33, %v4680_v38  ;;  %v3454_v38 = vsel %vm2143_vm15, 1.0, %v4007_v0  ;;  %vm890_vm15 = vcmask 1046534  }
 0x45c   : > { %v2659_v10 = vpop.xlane.xlu0 %2658  ;;  %v2242_v17 = vmul.f32 %v3454_v38, %v5242_v6 }
 0x45d   : > { %3717 = vperm.xlu1 %3675, %v3716_v32   ;;  %3707 = vperm.xlu0 %3669, %v3706_v24   ;;  %v2791_v34 = vmul.f32 %v4773_v50, %v2659_v10 }
 0x45f   : > { %v2799_v44 = vadd.f32 1.0, %v2791_v34 }
 0x460   : > { %v2662_v19 = vpop.xlane.xlu0 %2661 }
 0x461   : > { %3722 = vperm.xlu1 %3675, %v3721_v3   ;;  %2252 = vperm.xlu0 %3669, %v2235_v14   ;;  %v2792_v16 = vmul.f32 %v4818_v54, %v2662_v19 }
 0x463   : > { %v2800_v18 = vadd.f32 1.0, %v2792_v16 }
 0x464   : > { %v2665_v62 = vpop.xlane.xlu0 %2664 }
 0x465   : > { %2258 = vperm.xlu0 %3669, %v2237_v7   ;;  %2255 = vperm.xlu1 %3675, %v2236_v55   ;;  %v2793_v8 = vmul.f32 %v4822_v22, %v2665_v62 }
 0x467   : > { %v2801_v59 = vadd.f32 1.0, %v2793_v8 }
 0x468   : > { %v2656_v57 = vpop.xlane.xlu1 %2655 }
 0x469   : > { %2261 = vperm.xlu0 %3669, %v2238_v48   ;;  %2264 = vperm.xlu1 %3675, %v2239_v36   ;;  %v2790_v56 = vmul.f32 %v4810_v53, %v2656_v57 }
 0x46b   : > { %v2798_v58 = vadd.f32 1.0, %v2790_v56 }
 0x46c   : > { %v2668_v20 = vpop.xlane.xlu0 %2667  ;;  %v2696_v30 = vpop.xlane.xlu1 %2695 }
 0x46d   : > { %2267 = vperm.xlu0 %3669, %v2240_v5   ;;  %2270 = vperm.xlu1 %3675, %v2241_v51   ;;  %vm2806_vm2 = vcmp.gt.f32.partialorder %v2798_v58, %v2696_v30  ;;  %v2794_v47 = vmul.f32 %v4784_v31, %v2668_v20  ;;  %v5243_v20 = vld [vmem:[#allocation24_spill] sm:$0xff] }
 0x46e   : > { %v3468_v9 = vsel %vm2806_vm2, 1.0, %v4007_v0  ;;  %vm892_vm2 = vcmask 1047559  }
 0x46f   : > { %v2802_v61 = vadd.f32 1.0, %v2794_v47  ;;  %v2905_v19 = vmul.f32 %v3468_v9, %v4810_v53 }
 0x470   : > { %v2671_v12 = vpop.xlane.xlu0 %2670  ;;  %v2702_v37 = vpop.xlane.xlu1 %2701 }
 0x471   : > { %2273 = vperm.xlu1 %3675, %v2242_v17   ;;  %v2795_v26 = vmul.f32 %v4825_v41, %v2671_v12  ;;  %vm2808_vm3 = vcmp.gt.f32.partialorder %v2800_v18, %v2702_v37 }
 0x472   : > { %v3470_v40 = vsel %vm2808_vm3, 1.0, %v4007_v0  ;;  %vm3086_vm3 = vcmask 195584  }
 0x473   : > { %v2803_v42 = vadd.f32 1.0, %v2795_v26  ;;  %v3731_v33 = vpack.i.bf16 %v3470_v40, %v3453_v27  ;;  %v2907_v36 = vmul.f32 %v3470_v40, %v4818_v54 }
 0x474   : > { %v2674_v46 = vpop.xlane.xlu0 %2673  ;;  %v2711_v13 = vpop.xlane.xlu1 %2710 }
 0x475   : > { %vm2811_vm6 = vcmp.gt.f32.partialorder %v2803_v42, %v2711_v13  ;;  %v2796_v24 = vmul.f32 %v4797_v63, %v2674_v46 }
 0x476   : > { %v3473_v25 = vsel %vm2811_vm6, 1.0, %v4007_v0 }
 0x477   : > { %v2804_v3 = vadd.f32 1.0, %v2796_v24 }
 0x478   : > { %v2677_v29 = vpop.xlane.xlu0 %2676  ;;  %v2717_v4 = vpop.xlane.xlu1 %2716 }
 0x479   : > { %v2797_v49 = vmul.f32 %v4835_v2, %v2677_v29 }
 0x47b   : > { %v2805_v21 = vadd.f32 1.0, %v2797_v49 }
 0x47c   : > { %v2699_v35 = vpop.xlane.xlu0 %2698 }
 0x47d   : > { %vm2807_vm4 = vcmp.gt.f32.partialorder %v2799_v44, %v2699_v35  ;;  %vm2813_vm8 = vcmp.gt.f32.partialorder %v2805_v21, %v2717_v4 }
 0x47e   : > { %v3469_v39 = vsel %vm2807_vm4, 1.0, %v4007_v0  ;;  %v3475_v43 = vsel %vm2813_vm8, 1.0, %v4007_v0  ;;  %vm3099_vm4 = vcmask 261120  }
 0x47f   : > { %v3726_v1 = vpack.i.bf16 %v3469_v39, %v3468_v9  ;;  %v2906_v55 = vmul.f32 %v3469_v39, %v4773_v50  ;;  %v2910_v50 = vmul.f32 %v3473_v25, %v4825_v41  ;;  %v2912_v5 = vmul.f32 %v3475_v43, %v4835_v2 }
 0x480   : > { %v2705_v11 = vpop.xlane.xlu0 %2704 }
 0x481   : > { %vm2809_vm5 = vcmp.gt.f32.partialorder %v2801_v59, %v2705_v11  ;;  %3727 = vperm.xlu1 %3675, %v3726_v1  }
 0x482   : > { %v3471_v32 = vsel %vm2809_vm5, 1.0, %v4007_v0 }
 0x483   : > { %v3736_v10 = vpack.i.bf16 %v3471_v32, %v3454_v38  ;;  %v2908_v62 = vmul.f32 %v3471_v32, %v4822_v22 }
 0x484   : > { %v2708_v60 = vpop.xlane.xlu0 %2707 }
 0x485   : > { %vm2810_vm7 = vcmp.gt.f32.partialorder %v2802_v61, %v2708_v60  ;;  %3732 = vperm.xlu1 %3675, %v3731_v33   ;;  %3737 = vperm.xlu0 %3669, %v3736_v10  }
 0x486   : > { %v3472_v14 = vsel %vm2810_vm7, 1.0, %v4007_v0 }
 0x487   : > { %v3741_v45 = vpack.i.bf16 %v3473_v25, %v3472_v14  ;;  %v2909_v23 = vmul.f32 %v3472_v14, %v4784_v31 }
 0x488   : > { %v2714_v6 = vpop.xlane.xlu0 %2713 }
 0x489   : > { %vm2812_vm9 = vcmp.gt.f32.partialorder %v2804_v3, %v2714_v6  ;;  %3742 = vperm.xlu1 %3675, %v3741_v45  }
 0x48a   : > { %v3474_v28 = vsel %vm2812_vm9, 1.0, %v4007_v0 }
 0x48b   : > { %v3746_v7 = vpack.i.bf16 %v3475_v43, %v3474_v28  ;;  %v2911_v52 = vmul.f32 %v3474_v28, %v4797_v63  ;;  %v3678_v63 = vpop.permute.xlu1 %3677 }
 0x48c   : > { %v3679_v17 = vunpack.i.l.bf16 %v3678_v63  ;;  %v3680_v56 = vunpack.i.h.bf16 %v3678_v63 }
 0x48d   : > { %2922 = vperm.xlu1 %3675, %v2905_v19   ;;  %3747 = vperm.xlu0 %3669, %v3746_v7  }
 0x48e   : > { %v859_v46 = vrot.slane %v3679_v17, %v5243_v20  ;;  %v863_v34 = vrot.slane %v3680_v56, %v5243_v20 }
 0x48f   : > { %v3683_v30 = vpop.permute.xlu1 %3682 }
 0x490   : > { %v3672_v48 = vpop.permute.xlu0 %3671  ;;  %v3684_v2 = vunpack.i.l.bf16 %v3683_v30  ;;  %v3685_v29 = vunpack.i.h.bf16 %v3683_v30 }
 0x491   : > { %2934 = vperm.xlu1 %3675, %v2909_v23   ;;  %2925 = vperm.xlu0 %3669, %v2906_v55   ;;  %v3674_v51 = vunpack.i.h.bf16 %v3672_v48  ;;  %v3673_v54 = vunpack.i.l.bf16 %v3672_v48 }
 0x492   : > { %v867_v18 = vrot.slane %v3684_v2, %v5243_v20  ;;  %v871_v59 = vrot.slane %v3685_v29, %v5243_v20 }
 0x493   : > { %v855_v57 = vrot.slane %v3674_v51, %v5243_v20  ;;  %v851_v22 = vrot.slane %v3673_v54, %v5243_v20  ;;  %v916_v44 = vpop.permute.xlu1 %915 }
 0x494   : > { %v3688_v27 = vpop.permute.xlu0 %3687  ;;  %v941_v47 = vrot.slane %v916_v44, %v5243_v20 }
 0x495   : > { %2928 = vperm.xlu0 %3669, %v2907_v36   ;;  %2940 = vperm.xlu1 %3675, %v2911_v52   ;;  %v881_v41 = vsel %vm880_vm10, %v855_v57, %v851_v22  ;;  %v3689_v8 = vunpack.i.l.bf16 %v3688_v27  ;;  %v3690_v49 = vunpack.i.h.bf16 %v3688_v27 }
 0x496   : > { %v883_v16 = vsel %vm882_vm11, %v859_v46, %v881_v41 }
 0x497   : > { %v885_v37 = vsel %vm884_vm12, %v863_v34, %v883_v16  ;;  %v875_v39 = vrot.slane %v3689_v8, %v5243_v20  ;;  %v937_v10 = vpop.permute.xlu1 %936  ;;  %v879_v60 = vrot.slane %v3690_v49, %v5243_v20 }
 0x498   : > { %v919_v53 = vpop.permute.xlu0 %918  ;;  %v887_v35 = vsel %vm886_vm13, %v867_v18, %v885_v37  ;;  %v969_v45 = vrot.slane %v937_v10, %v5243_v20 }
 0x499   : > { %2931 = vperm.xlu0 %3669, %v2908_v62   ;;  %1655 = vrot.lane.b32.xlu1 %v4830_v15, %s4009_s12  ;;  %v945_v26 = vrot.slane %v919_v53, %v5243_v20  ;;  %v889_v13 = vsel %vm888_vm14, %v871_v59, %v887_v35 }
 0x49a   : > { %v891_v21 = vsel %vm890_vm15, %v875_v39, %v889_v13 }
 0x49b   : > { %v970_v11 = vsel %vm880_vm10, %v945_v26, %v941_v47  ;;  %v893_v14 = vsel %vm892_vm2, %v879_v60, %v891_v21 }
 0x49c   : > { %v922_v31 = vpop.permute.xlu0 %921  ;;  %v895_v43 = vsel %vm386_vm1, %v893_v14, 0.0 }
 0x49d   : > { %2937 = vperm.xlu0 %3669, %v2910_v50   ;;  %v949_v9 = vrot.slane %v922_v31, %v5243_v20 }
 0x49f   : > { %v971_v33 = vsel %vm882_vm11, %v949_v9, %v970_v11 }
 0x4a0   : > { %v925_v38 = vpop.permute.xlu0 %924 }
 0x4a1   : > { %2943 = vperm.xlu0 %3669, %v2912_v5   ;;  %v953_v40 = vrot.slane %v925_v38, %v5243_v20 }
 0x4a3   : > { %v972_v24 = vsel %vm884_vm12, %v953_v40, %v971_v33 }
 0x4a4   : > { %v928_v12 = vpop.permute.xlu0 %927 }
 0x4a5   : > { %v957_v1 = vrot.slane %v928_v12, %v5243_v20 }
 0x4a7   : > { %v973_v25 = vsel %vm886_vm13, %v957_v1, %v972_v24 }
 0x4a8   : > { %v931_v58 = vpop.permute.xlu0 %930 }
 0x4a9   : > { %v961_v61 = vrot.slane %v931_v58, %v5243_v20 }
 0x4ab   : > { %v974_v4 = vsel %vm888_vm14, %v961_v61, %v973_v25 }
 0x4ac   : > { %v934_v42 = vpop.permute.xlu0 %933 }
 0x4ad   : > { %v965_v32 = vrot.slane %v934_v42, %v5243_v20 }
 0x4af   : > { %v975_v3 = vsel %vm890_vm15, %v965_v32, %v974_v4 }
 0x4b0   : > { %v976_v28 = vsel %vm892_vm2, %v969_v45, %v975_v3 }
 0x4b1   : > { %v978_v19 = vsel %vm386_vm1, %v976_v28, 0.0 }
 0x4bc   : > { %v3693_v6 = vpop.permute.xlu1 %3692 }
 0x4bd   : > { %896 = vadd.xlane.f32.xlu1 %v895_v43  ;;  %v3695_v5 = vunpack.i.h.bf16 %v3693_v6  ;;  %v3694_v38 = vunpack.i.l.bf16 %v3693_v6 }
 0x4bf   : > { %v1528_v12 = vrot.slane %v3695_v5, %v5243_v20  ;;  %v1524_v41 = vrot.slane %v3694_v38, %v5243_v20 }
 0x4c0   : > { %v3703_v7 = vpop.permute.xlu1 %3702  ;;  %979 = vadd.xlane.f32.xlu0 %v978_v19  ;;  %v3698_v55 = vpop.permute.xlu0 %3697 }
 0x4c1   : > { %v3699_v22 = vunpack.i.l.bf16 %v3698_v55  ;;  %v3700_v46 = vunpack.i.h.bf16 %v3698_v55  ;;  %v1553_v18 = vsel %vm880_vm10, %v1528_v12, %v1524_v41  ;;  %v3704_v26 = vunpack.i.l.bf16 %v3703_v7 }
 0x4c2   : > { %v3705_v40 = vunpack.i.h.bf16 %v3703_v7 }
 0x4c3   : > { %v1532_v34 = vrot.slane %v3699_v22, %v5243_v20  ;;  %v1536_v8 = vrot.slane %v3700_v46, %v5243_v20  ;;  %v1540_v49 = vrot.slane %v3704_v26, %v5243_v20 }
 0x4c4   : > { %v1582_v23 = vpop.permute.xlu1 %1581  ;;  %v1585_v48 = vpop.permute.xlu0 %1584  ;;  %v1544_v32 = vrot.slane %v3705_v40, %v5243_v20 }
 0x4c5   : > { %v1607_v27 = vrot.slane %v1582_v23, %v5243_v20  ;;  %v1611_v62 = vrot.slane %v1585_v48, %v5243_v20  ;;  %v1554_v35 = vsel %vm882_vm11, %v1532_v34, %v1553_v18 }
 0x4c6   : > { %v1555_v42 = vsel %vm884_vm12, %v1536_v8, %v1554_v35 }
 0x4c7   : > { %v1636_v51 = vsel %vm880_vm10, %v1611_v62, %v1607_v27  ;;  %v1556_v33 = vsel %vm886_vm13, %v1540_v49, %v1555_v42 }
 0x4c8   : > { %v1588_v36 = vpop.permute.xlu1 %1587  ;;  %v1591_v52 = vpop.permute.xlu0 %1590  ;;  %v1557_v60 = vsel %vm888_vm14, %v1544_v32, %v1556_v33 }
 0x4c9   : > { %v1615_v53 = vrot.slane %v1588_v36, %v5243_v20  ;;  %v1619_v54 = vrot.slane %v1591_v52, %v5243_v20 }
 0x4cb   : > { %v1637_v63 = vsel %vm882_vm11, %v1615_v53, %v1636_v51 }
 0x4cc   : > { %v1597_v50 = vpop.permute.xlu1 %1596  ;;  %v1594_v31 = vpop.permute.xlu0 %1593  ;;  %v1638_v56 = vsel %vm884_vm12, %v1619_v54, %v1637_v63 }
 0x4cd   : > { %v1623_v57 = vrot.slane %v1594_v31, %v5243_v20  ;;  %v1627_v30 = vrot.slane %v1597_v50, %v5243_v20 }
 0x4cf   : > { %v1639_v2 = vsel %vm886_vm13, %v1623_v57, %v1638_v56 }
 0x4d0   : > { %v1600_v17 = vpop.permute.xlu1 %1599  ;;  %v1640_v37 = vsel %vm888_vm14, %v1627_v30, %v1639_v2 }
 0x4d1   : > { %v1631_v16 = vrot.slane %v1600_v17, %v5243_v20 }
 0x4d3   : > { %v1641_v44 = vsel %vm890_vm15, %v1631_v16, %v1640_v37 }
 0x4d4   : > { %v1603_v58 = vpop.permute.xlu1 %1602 }
 0x4d5   : > { %v1635_v29 = vrot.slane %v1603_v58, %v5243_v20 }
 0x4d7   : > { %v1642_v59 = vsel %vm892_vm2, %v1635_v29, %v1641_v44 }
 0x4d8   : > { %v3713_v9 = vpop.permute.xlu1 %3712  ;;  %v1644_v47 = vsel %vm386_vm1, %v1642_v59, 0.0 }
 0x4d9   : > { %v3714_v39 = vunpack.i.l.bf16 %v3713_v9  ;;  %1645 = vadd.xlane.f32.xlu0 %v1644_v47  ;;  %v3715_v30 = vunpack.i.h.bf16 %v3713_v9 }
 0x4db   : > { %v1548_v11 = vrot.slane %v3714_v39, %v5243_v20  ;;  %v2203_v2 = vrot.slane %v3715_v30, %v5243_v20 }
 0x4dc   : > { %v3718_v1 = vpop.permute.xlu1 %3717  ;;  %v3708_v13 = vpop.permute.xlu0 %3707 }
 0x4dd   : > { %v3719_v61 = vunpack.i.l.bf16 %v3718_v1  ;;  %v1558_v25 = vsel %vm890_vm15, %v1548_v11, %v1557_v60  ;;  %v3710_v57 = vunpack.i.h.bf16 %v3708_v13  ;;  %v3709_v22 = vunpack.i.l.bf16 %v3708_v13 }
 0x4de   : > { %v3720_v41 = vunpack.i.h.bf16 %v3718_v1 }
 0x4df   : > { %v1552_v24 = vrot.slane %v3719_v61, %v5243_v20  ;;  %v2199_v12 = vrot.slane %v3710_v57, %v5243_v20  ;;  %v2195_v56 = vrot.slane %v3709_v22, %v5243_v20 }
 0x4e0   : > { %v3723_v21 = vpop.permute.xlu1 %3722  ;;  %v2253_v10 = vpop.permute.xlu0 %2252  ;;  %v2207_v58 = vrot.slane %v3720_v41, %v5243_v20 }
 0x4e1   : > { %v1559_v4 = vsel %vm892_vm2, %v1552_v24, %v1558_v25  ;;  %v2278_v6 = vrot.slane %v2253_v10, %v5243_v20  ;;  %v2224_v46 = vsel %vm880_vm10, %v2199_v12, %v2195_v56  ;;  %v3724_v16 = vunpack.i.l.bf16 %v3723_v21 }
 0x4e2   : > { %v1561_v14 = vsel %vm386_vm1, %v1559_v4, 0.0  ;;  %v2225_v34 = vsel %vm882_vm11, %v2203_v2, %v2224_v46  ;;  %v3725_v29 = vunpack.i.h.bf16 %v3723_v21 }
 0x4e3   : > { %1562 = vadd.xlane.f32.xlu1 %v1561_v14  ;;  %v2211_v18 = vrot.slane %v3724_v16, %v5243_v20  ;;  %v2226_v26 = vsel %vm884_vm12, %v2207_v58, %v2225_v34 }
 0x4e4   : > { %v2256_v3 = vpop.permute.xlu1 %2255  ;;  %v2259_v45 = vpop.permute.xlu0 %2258  ;;  %v2215_v35 = vrot.slane %v3725_v29, %v5243_v20 }
 0x4e5   : > { %v2282_v43 = vrot.slane %v2256_v3, %v5243_v20  ;;  %v2286_v28 = vrot.slane %v2259_v45, %v5243_v20  ;;  %v2227_v40 = vsel %vm886_vm13, %v2211_v18, %v2226_v26 }
 0x4e6   : > { %v2228_v10 = vsel %vm888_vm14, %v2215_v35, %v2227_v40 }
 0x4e7   : > { %v2307_v19 = vsel %vm880_vm10, %v2282_v43, %v2278_v6 }
 0x4e8   : > { %v2265_v7 = vpop.permute.xlu1 %2264  ;;  %v2262_v55 = vpop.permute.xlu0 %2261  ;;  %v2308_v48 = vsel %vm882_vm11, %v2286_v28, %v2307_v19 }
 0x4e9   : > { %v2290_v23 = vrot.slane %v2262_v55, %v5243_v20  ;;  %v2294_v36 = vrot.slane %v2265_v7, %v5243_v20 }
 0x4eb   : > { %v2309_v52 = vsel %vm884_vm12, %v2290_v23, %v2308_v48 }
 0x4ec   : > { %v2271_v27 = vpop.permute.xlu1 %2270  ;;  %v2268_v62 = vpop.permute.xlu0 %2267  ;;  %v2310_v31 = vsel %vm886_vm13, %v2294_v36, %v2309_v52 }
 0x4ed   : > { %v2298_v53 = vrot.slane %v2268_v62, %v5243_v20  ;;  %v2302_v50 = vrot.slane %v2271_v27, %v5243_v20 }
 0x4ef   : > { %v2311_v5 = vsel %vm888_vm14, %v2298_v53, %v2310_v31 }
 0x4f0   : > { %v2274_v51 = vpop.permute.xlu1 %2273  ;;  %v2312_v38 = vsel %vm890_vm15, %v2302_v50, %v2311_v5 }
 0x4f1   : > { %v2306_v54 = vrot.slane %v2274_v51, %v5243_v20 }
 0x4f3   : > { %v2313_v63 = vsel %vm892_vm2, %v2306_v54, %v2312_v38 }
 0x4f4   : > { %v2315_v17 = vsel %vm386_vm1, %v2313_v63, 0.0 }
 0x4f5   : > { %2316 = vadd.xlane.f32.xlu1 %v2315_v17 }
 0x500   : > { %v3728_v37 = vpop.permute.xlu1 %3727 }
 0x501   : > { %v3730_v8 = vunpack.i.h.bf16 %v3728_v37  ;;  %v3729_v44 = vunpack.i.l.bf16 %v3728_v37 }
 0x503   : > { %v2869_v59 = vrot.slane %v3730_v8, %v5243_v20  ;;  %v2865_v9 = vrot.slane %v3729_v44, %v5243_v20 }
 0x504   : > { %v3733_v47 = vpop.permute.xlu1 %3732  ;;  %v3738_v39 = vpop.permute.xlu0 %3737 }
 0x505   : > { %v3735_v42 = vunpack.i.h.bf16 %v3733_v47  ;;  %v3734_v49 = vunpack.i.l.bf16 %v3733_v47  ;;  %v3740_v1 = vunpack.i.h.bf16 %v3738_v39  ;;  %v3739_v13 = vunpack.i.l.bf16 %v3738_v39  ;;  %v5244_v39 = vld [vmem:[#allocation25_spill] sm:$0xff] }
 0x506   : > { %v2894_v33 = vsel %vm880_vm10, %v2869_v59, %v2865_v9 }
 0x507   : > { %v2873_v11 = vrot.slane %v3735_v42, %v5243_v20  ;;  %v2219_v61 = vrot.slane %v3734_v49, %v5243_v20  ;;  %v2877_v32 = vrot.slane %v3740_v1, %v5243_v20  ;;  %v2223_v24 = vrot.slane %v3739_v13, %v5243_v20 }
 0x508   : > { %v3743_v21 = vpop.permute.xlu1 %3742 }
 0x509   : > { %v2895_v60 = vsel %vm882_vm11, %v2873_v11, %v2894_v33  ;;  %v3745_v25 = vunpack.i.h.bf16 %v3743_v21  ;;  %v3744_v4 = vunpack.i.l.bf16 %v3743_v21  ;;  %v2229_v14 = vsel %vm890_vm15, %v2219_v61, %v2228_v10  ;;  %v5245_v61 = vld [vmem:[#allocation26_spill] sm:$0xff] }
 0x50a   : > { %v2230_v3 = vsel %vm892_vm2, %v2223_v24, %v2229_v14  ;;  %v2896_v43 = vsel %vm884_vm12, %v2877_v32, %v2895_v60  ;;  %v5246_v14 = vld [vmem:[#allocation27_spill] sm:$0xff] }
 0x50b   : > { %v2881_v45 = vrot.slane %v3744_v4, %v5243_v20  ;;  %v2232_v6 = vsel %vm386_vm1, %v2230_v3, 0.0  ;;  %v2885_v28 = vrot.slane %v3745_v25, %v5243_v20 }
 0x50c   : > { %v3748_v19 = vpop.permute.xlu0 %3747  ;;  %2233 = vadd.xlane.f32.xlu0 %v2232_v6  ;;  %v2923_v62 = vpop.permute.xlu1 %2922 }
 0x50d   : > { %v2897_v7 = vsel %vm886_vm13, %v2881_v45, %v2896_v43  ;;  %v3750_v55 = vunpack.i.h.bf16 %v3748_v19  ;;  %v3749_v23 = vunpack.i.l.bf16 %v3748_v19  ;;  %v2948_v38 = vrot.slane %v2923_v62, %v5243_v20  ;;  %v3088_v62 = vld [vmem:[#allocation8] sm:$0xff] }
 0x50e   : > { %v2898_v27 = vsel %vm888_vm14, %v2885_v28, %v2897_v7 }
 0x50f   : > { %v2893_v48 = vrot.slane %v3750_v55, %v5243_v20  ;;  %v2889_v36 = vrot.slane %v3749_v23, %v5243_v20  ;;  %v5247_v23 = vld [vmem:[#allocation28_spill] sm:$0xff] }
 0x510   : > { %v2926_v52 = vpop.permute.xlu0 %2925  ;;  %v2935_v63 = vpop.permute.xlu1 %2934 }
 0x511   : > { %v2899_v53 = vsel %vm890_vm15, %v2889_v36, %v2898_v27  ;;  %v2952_v51 = vrot.slane %v2926_v52, %v5243_v20  ;;  %v2964_v30 = vrot.slane %v2935_v63, %v5243_v20 }
 0x512   : > { %v2900_v50 = vsel %vm892_vm2, %v2893_v48, %v2899_v53  ;;  %v3089_v53 = vld [vmem:[#allocation8 + $0x8] sm:$0xff] }
 0x513   : > { %v2902_v31 = vsel %vm386_vm1, %v2900_v50, 0.0  ;;  %v2977_v22 = vsel %vm880_vm10, %v2952_v51, %v2948_v38  ;;  %v4014_v50 = vmov 0.0|0.0  }
 0x514   : > { %v2929_v5 = vpop.permute.xlu0 %2928  ;;  %2903 = vadd.xlane.f32.xlu1 %v2902_v31  ;;  %v2941_v46 = vpop.permute.xlu1 %2940  ;;  %3561 = vmatprep.subr.bf16.mxu1 %v4014_v50  ;;  %v3562_v31 = vpack.c.bf16 %v3089_v53, %v3088_v62 }
 0x515   : > { %v2956_v54 = vrot.slane %v2929_v5, %v5243_v20  ;;  %v2972_v58 = vrot.slane %v2941_v46, %v5243_v20 }
 0x516   : > { %3563 = vmatpush3.bf16.msra.mxu1 %v3562_v31 }
 0x517   : > { %v2978_v12 = vsel %vm882_vm11, %v2956_v54, %v2977_v22  ;;  %3564 = vmatprep.subr.bf16.mxu1 %v4014_v50  ;;  %v3090_v54 = vld [vmem:[#allocation8 + $0x10] sm:$0xff] }
 0x518   : > { %v2932_v57 = vpop.permute.xlu0 %2931  ;;  %v1656_v26 = vpop.permute.xlu1 %1655 }
 0x519   : > { %v2960_v17 = vrot.slane %v2932_v57, %v5243_v20 }
 0x51b   : > { %v2979_v56 = vsel %vm884_vm12, %v2960_v17, %v2978_v12 }
 0x51c   : > { %v2938_v41 = vpop.permute.xlu0 %2937  ;;  %v2980_v16 = vsel %vm886_vm13, %v2964_v30, %v2979_v56 }
 0x51d   : > { %v2968_v2 = vrot.slane %v2938_v41, %v5243_v20 }
 0x51f   : > { %v2981_v34 = vsel %vm888_vm14, %v2968_v2, %v2980_v16 }
 0x520   : > { %v2944_v29 = vpop.permute.xlu0 %2943  ;;  %v2982_v18 = vsel %vm890_vm15, %v2972_v58, %v2981_v34 }
 0x521   : > { %v2976_v37 = vrot.slane %v2944_v29, %v5243_v20 }
 0x523   : > { %v2983_v8 = vsel %vm892_vm2, %v2976_v37, %v2982_v18 }
 0x524   : > { %v2985_v44 = vsel %vm386_vm1, %v2983_v8, 0.0 }
 0x525   : > { %2986 = vadd.xlane.f32.xlu0 %v2985_v44  ;;  %2995 = vrot.lane.b32.xlu1 %v4830_v15, %s4011_s6 }
 0x53b   : > { %2325 = vrot.lane.b32.xlu0 %v4830_v15, %s4010_s18 }
 0x54a   : > { %v897_v35 = vpop.xlane.xlu1 %896 }
 0x54b   : > { %3751 = vrcp.f32 %v897_v35 }
 0x54d   : > { %v980_v59 = vpop.xlane.xlu0 %979 }
 0x54e   : > { %v3414_v9 = vadd.f32 -1.0, %v980_v59 }
 0x555   : > { %v3752_v47 = vpop.eup %3751 }
 0x556   : > { %v983_v20 = vmul.f32 %v3752_v47, %v3414_v9 }
 0x558   : > { %v984_v40 = vsub.f32 %v5244_v39, %v983_v20 }
 0x55a   : > { %v985_v42 = vmax.f32 %v984_v40, 0.0 }
 0x55c   : > { %986 = vst.msk [vmem:[%s5055_s26] sm:$0xff] %vm386_vm1, %v985_v42  ;;  %3518 = vmatmul.mubr.msk.f32.vlgmr.msra.gmra.mrb[2].mxu0 %vm386_vm1, %v985_v42 }
 0x55d   : > { %3526 = vmatpush3.msra.mxu0 %v1656_v26  ;;  %3527 = vmatprep.mubr.msk.f32.mxu0 %vm4008_vm0, %v4007_v0 }
 0x55e   : > { %3535 = vmatprep.subr.mxu0 %v4007_v0 }
 0x566   : > { %v1646_v49 = vpop.xlane.xlu0 %1645 }
 0x567   : > { %v3434_v1 = vadd.f32 -1.0, %v1646_v49 }
 0x570   : > { %v1563_v15 = vpop.xlane.xlu1 %1562 }
 0x571   : > { %3753 = vrcp.f32 %v1563_v15 }
 0x57b   : > { %v3754_v13 = vpop.eup %3753 }
 0x57c   : > { %v1649_v11 = vmul.f32 %v3754_v13, %v3434_v1 }
 0x57e   : > { %v1650_v33 = vsub.f32 %v5245_v61, %v1649_v11 }
 0x580   : > { %v1651_v32 = vmax.f32 %v1650_v33, 0.0 }
 0x582   : > { %3435 = vst.msk [vmem:[%s5055_s26 + $0x8] sm:$0xff] %vm386_vm1, %v1651_v32  ;;  %3528 = vmatmul.mubr.msk.f32.vlgmr.msra.gmra.mrb[4].mxu0 %vm386_vm1, %v1651_v32  ;;  %v2317_v21 = vpop.xlane.xlu1 %2316 }
 0x583   : > { %3537 = vmatprep.mubr.msk.f32.mxu0 %vm4008_vm0, %v4007_v0  ;;  %v3455_v10 = vadd.f32 -1.0, %v2317_v21 }
 0x599   : > { %v2234_v24 = vpop.xlane.xlu0 %2233 }
 0x59a   : > { %3755 = vrcp.f32 %v2234_v24 }
 0x5a1   : > { %v2904_v4 = vpop.xlane.xlu1 %2903 }
 0x5a2   : > { %3757 = vrcp.f32 %v2904_v4 }
 0x5a4   : > { %v3756_v60 = vpop.eup %3755 }
 0x5a5   : > { %v2320_v25 = vmul.f32 %v3756_v60, %v3455_v10  ;;  %v2996_v55 = vpop.permute.xlu1 %2995 }
 0x5a7   : > { %v2321_v3 = vsub.f32 %v5246_v14, %v2320_v25 }
 0x5a9   : > { %v2322_v45 = vmax.f32 %v2321_v3, 0.0 }
 0x5ab   : > { %3456 = vst.msk [vmem:[%s5055_s26 + $0x10] sm:$0xff] %vm386_vm1, %v2322_v45 }
 0x5ac   : > { %v3758_v28 = vpop.eup %3757 }
 0x5b2   : > { %v2987_v6 = vpop.xlane.xlu0 %2986 }
 0x5b3   : > { %v3476_v43 = vadd.f32 -1.0, %v2987_v6 }
 0x5b5   : > { %v2990_v19 = vmul.f32 %v3758_v28, %v3476_v43 }
 0x5b6   : > { %v2326_v7 = vpop.permute.xlu0 %2325 }
 0x5b7   : > { %v2991_v48 = vsub.f32 %v5247_v23, %v2990_v19  ;;  %3536 = vmatpush3.msra.mxu0 %v2326_v7 }
 0x5b8   : > { %3538 = vmatmul.mubr.msk.f32.vlgmr.msra.gmra.mrb[6].mxu0 %vm386_vm1, %v2322_v45  ;;  %3545 = vmatprep.subr.mxu0 %v4007_v0 }
 0x5b9   : > { %v2992_v36 = vmax.f32 %v2991_v48, 0.0  ;;  %3546 = vmatpush3.msra.mxu0 %v2996_v55  ;;  %3547 = vmatprep.mubr.msk.f32.mxu0 %vm4008_vm0, %v4007_v0  ;;  %v3091_v0 = vld [vmem:[#allocation8 + $0x18] sm:$0xff]  ;;  %vm3084_vm0 = vcmask 130048  }
 0x5ba   : > { %v3565_v38 = vpack.c.bf16 %v3091_v0, %v3090_v54 }
 0x5bb   : > { %3477 = vst.msk [vmem:[%s5055_s26 + $0x18] sm:$0xff] %vm386_vm1, %v2992_v36 }
 0x5bc   : > { %3548 = vmatmul.mubr.msk.f32.vlgmr.msra.gmra.mrb[8].mxu0 %vm386_vm1, %v2992_v36  ;;  %3566 = vmatpush3.bf16.msra.mxu1 %v3565_v38 }
 0x62f   : > { %v1056_v52 = vpop.f32.mrb[2].mxu0 }
 0x630   : > { %v3519_v27 = vpop.f32.mrb[3].mxu0 }
 0x655   : > { %v1727_v5 = vpop.f32.mrb[4].mxu0 }
 0x656   : > { %3072 = vrot.lane.b32.xlu1 %v1727_v5, %s4015_s10  ;;  %v3529_v51 = vpop.f32.mrb[5].mxu0 }
 0x68b   : > { %v2397_v63 = vpop.f32.mrb[6].mxu0 }
 0x68c   : > { %3076 = vrot.lane.b32.xlu0 %v2397_v63, %s4016_s16  ;;  %v3539_v57 = vpop.f32.mrb[7].mxu0 }
 0x68f   : > { %v3067_v22 = vpop.f32.mrb[8].mxu0 }
 0x690   : > { %3080 = vrot.lane.b32.xlu1 %v3067_v22, %s4017_s11  ;;  %v3549_v17 = vpop.f32.mrb[9].mxu0 }
 0x6c8   : > { %v3073_v12 = vpop.permute.xlu1 %3072 }
 0x6c9   : > { %v3083_v30 = vsel %vm386_vm1, %v1056_v52, %v3073_v12 }
 0x6fe   : > { %v3077_v56 = vpop.permute.xlu0 %3076 }
 0x6ff   : > { %v3085_v41 = vsel %vm3084_vm0, %v3083_v30, %v3077_v56 }
 0x702   : > { %v3081_v46 = vpop.permute.xlu1 %3080 }
 0x703   : > { %v3087_v2 = vsel %vm3086_vm3, %v3085_v41, %v3081_v46 }
 0x704   : > { %3559 = vmatmul.mubr.msk.f32.vlgmr.msra.gmra.mrb[6].mxu1 %vm3099_vm4, %v3087_v2 }
 0x705   : > { %3890 = shalt.err (!%p3887_p12)
}
 0x706   : > { %s3891_s17 = scalar_lea.hbm %s5088_s8, 512  ;;  %s3895_s12 = scalar_lea.hbm %s5248_s7, 1024 }
 0x707   : > { %p3892_p0 = scmp.ne.s32.totalorder %s5088_s8, %s3891_s17  ;;  %p3896_p9 = scmp.lt.u32.totalorder %s5088_s8, %s5248_s7 }
 0x708   : > { %p3897_p4 = scmp.lt.u32.totalorder %s3895_s12, %s3891_s17  ;;  %p3899_p5 = scmp.lt.u32.totalorder %s3891_s17, %s5088_s8 }
 0x709   : > { %p3893_p11 = pnand %p3892_p0, %p5249_p10 }
 0x70a   : > { %p3898_p2 = por %p3897_p4, %p3896_p9 }
 0x70b   : > { %p3894_p1 = pneg %p3893_p11 }
 0x70c   : > { %p3900_p13 = por %p3899_p5, %p3898_p2 }
 0x70e   : > { %p3901_p7 = pnand %p3900_p13, %p3894_p1 }
 0x710   : > { %3904 = shalt.err (!%p3901_p7)
}
 0x711   : > { %s4019_s25 = smov 128   ;;  %s5250_s11 = sld [smem:[#allocation32_spill]] }
 0x712   : > { %3578 = dma.vmem_to_hbm [thread:$0]  (%p5249_p10), %s5090_s27, 512, %s5088_s8, %s3180_s1, %s4019_s25, %s4019_s25, %s4015_s10  }
 0x713   : > { %s3483_s29 = sshll.u32 %s3991_s24, 7  ;;  %s375_s30 = scalar_lea.vmem [#allocation10], %s4280_s21 }
 0x714   : > { %s3194_s28 = sshll.u32 %s375_s30, 4  ;;  %s5251_s4 = sld [smem:[#allocation33_spill]]  ;;  %s5127_s28 = int_to_ptr.vmem [resolvable:$true] %s3194_s28 }
 0x715   : > { %s3175_s10 = scalar_lea.sflag [#allocation4], %s4277_s19  ;;  %s3905_s27 = scalar_lea.vmem %s5127_s28, 128 }
 0x716   : > { %p3906_p3 = scmp.ne.s32.totalorder %s5127_s28, %s3905_s27  ;;  %s4020_s24 = smov [#allocation10]  }
 0x717   : > { %v3479_v16 = vld [vmem:[%s5250_s11] ss:$0 sm:$0xff]  ;;  %s3909_s21 = sshll.u32 %s4020_s24, 4  ;;  %s3910_s21 = int_to_ptr.vmem [resolvable:$false] %s3909_s21 }
 0x718   : > { %p3907_p6 = pnand %p3906_p3, %p5249_p10  ;;  %s3911_s8 = scalar_lea.vmem %s3910_s21, 256 }
 0x719   : > { %p3912_p12 = scmp.lt.s32.totalorder %s5127_s28, %s3910_s21  ;;  %p3913_p0 = scmp.lt.s32.totalorder %s3911_s8, %s3905_s27 }
 0x71a   : > { %s5125_s9 = scalar_lea.hbm %s5251_s4, %s3483_s29  ;;  %p3908_p8 = pneg %p3907_p6 }
 0x71b   : > { %p3914_p11 = por %p3913_p0, %p3912_p12 }
 0x71d   : > { %p3915_p1 = pnand %p3914_p11, %p3908_p8 }
 0x7d7   : > { %v3169_v34 = vpop.f32.mrb[6].mxu1 }
 0x7d8   : > { %v3170_v58 = vadd.f32 %v3479_v16, %v3169_v34  ;;  %v3560_v29 = vpop.f32.mrb[7].mxu1 }
 0x7da   : > { %3173 = vst.msk [vmem:[%s375_s30] sm:$0xff] %vm3099_vm4, %v3170_v58 }
 0x7db   : > { %3918 = shalt.err (!%p3915_p1)
}
 0x7dc   : > { %s3919_s19 = scalar_lea.hbm %s5125_s9, 128  ;;  %s3923_s13 = scalar_lea.hbm %s5251_s4, 256 }
 0x7dd   : > { %p3920_p9 = scmp.ne.s32.totalorder %s5125_s9, %s3919_s19  ;;  %p3924_p5 = scmp.lt.u32.totalorder %s5125_s9, %s5251_s4 }
 0x7de   : > { %p3925_p13 = scmp.lt.u32.totalorder %s3923_s13, %s3919_s19  ;;  %p3927_p3 = scmp.lt.u32.totalorder %s3919_s19, %s5125_s9 }
 0x7df   : > { %p3921_p4 = pnand %p3920_p9, %p5249_p10 }
 0x7e0   : > { %p3926_p7 = por %p3925_p13, %p3924_p5 }
 0x7e1   : > { %p3922_p2 = pneg %p3921_p4 }
 0x7e2   : > { %p3928_p6 = por %p3927_p3, %p3926_p7 }
 0x7e4   : > { %p3929_p8 = pnand %p3928_p6, %p3922_p2 }
 0x7e6   : > { %3932 = shalt.err (!%p3929_p8)
}
 0x7e7   : > { %3577 = dma.vmem_to_hbm [thread:$0]  (%p5249_p10), %s5127_s28, 128, %s5125_s9, %s3175_s10  }
 0x7e8 PF: > { %s5252_s18 = sld [smem:[#allocation18_spill]]  ;;  %s5253_s6 = sld [smem:[#allocation23_spill]] }
 0x7e9   : > { %s5254_s25 = sld [smem:[#allocation20_spill]] }
 0x7ee   : > { %s3223_s26 = sand.u32 1, %s5252_s18   ;;  %p5255_p12 = scmp.ne.s32.totalorder %s5253_s6, 0 }
 0x7ef   : > { %p5256_p0 = scmp.ge.s32.totalorder %s5254_s25, 2  ;;  %s3224_s16 = scalar_lea.sflag [#allocation4], %s3223_s26 }
 0x7f1   : > { %p3596_p11 = pnand %p5256_p0, %p5255_p12 }
 0x7f3   : > { %3970 = dma.done.wait (!%p3596_p11), %s3224_s16, 128  }
 0x7f4   : > { %3972 = vsyncadd (!%p3596_p11), %s3224_s16, 4294967168  ;;  %s3233_s11 = scalar_lea.sflag [#allocation12], %s3223_s26 }
 0x7f5   : > { %3974 = dma.done.wait (!%p3596_p11), %s3233_s11, 512  }
 0x7f6   : > { %3976 = vsyncadd (!%p3596_p11), %s3233_s11, 4294966784  ;;  %s30_s26 = sadd.s32 1, %s5254_s25   ;;  %s5257_s14 = sld [smem:[#allocation22_spill]] }
 0x7f7   : > { %p27_p1 = scmp.ge.s32.totalorder %s30_s26, 4   ;;  %s5258_s24 = sld [smem:[#allocation19_spill]] }
 0x7f8   : > { %s5259_s25 = sld [smem:[#allocation21_spill]]  ;;  %s5260_s21 = smov %s3983_s22 }
 0x7f9   : > { %s5261_s22 = smov %s3987_s23  ;;  %29 = sbr.rel (!%p27_p1) target bundleno = 16 (0x10), region = 133 }
 0x7fc   : > { %s5262_s23 = smov %s5257_s14 }
 0x800   :  { %3238 = vsyncpa [#allocation3], 1 }
 0x801   :  { %3240 = vsyncpa [#allocation3 + $0x1], 1 }
 0x802   :  { %3241 = vsyncpa [#allocation6], 1 }
 0x803   :  { %3243 = vsyncpa [#allocation6 + $0x1], 1 }
 0x804   :  { %3244 = vsyncpa [#allocation9], 1 }
 0x805   :  { %3245 = vsyncpa [#allocation4], 1 }
 0x806   :  { %3247 = vsyncpa [#allocation4 + $0x1], 1 }
 0x807   :  { %3248 = vsyncpa [#allocation12], 1 }
 0x808   :  { %3250 = vsyncpa [#allocation12 + $0x1], 1 }

</bundles_post_ra>
